<compile_context>
chip_gen: v5e
topology: v5e:2x2
jax: 0.10.0
libtpu: 0.0.40
codegen_flags: <defaults>
</compile_context>

<pallas_src>
import jax
import jax.numpy as jnp
from jax.experimental import pallas as pl
from jax.experimental.pallas import tpu as pltpu

BM = 128  # batch rows per grid step (multiple of 8; fills the MXU row dim)


def cnn_kernel(x_ref, w1_ref, w2_ref, wf_ref, bias_ref, o_ref):
    # x_ref:    (BM, 616)  f32   input rows (one sample per row)
    # w1_ref:   (616, 64)  bf16  conv1 weights, pre-transposed (reduction-major)
    # w2_ref:   (64, 32)   f32   conv2 (1x1) weights, pre-transposed
    # wf_ref:   (32, 2)    f32   fc1 weights, pre-transposed
    # bias_ref: (3, 128)   f32   row 0: b1[0:64], row 1: b2[0:32], row 2: bf[0:2]
    # o_ref:    (BM, 2)    f32
    x = x_ref[...].astype(jnp.bfloat16)          # native bf16 MXU path

    b1 = bias_ref[0:1, 0:64]                     # (1, 64)
    b2 = bias_ref[1:2, 0:32]                     # (1, 32)
    bf = bias_ref[2:3, 0:2]                      # (1, 2)

    # conv1 (kernel spans full width) == matmul, bias, ReLU   (f32 accumulate)
    h1 = jnp.dot(x, w1_ref[...], preferred_element_type=jnp.float32) + b1
    h1 = jnp.maximum(h1, 0.0)

    # conv2 (1x1) == matmul, bias, ReLU
    h2 = jnp.dot(h1, w2_ref[...], preferred_element_type=jnp.float32) + b2
    h2 = jnp.maximum(h2, 0.0)

    # fc1 + sigmoid
    logits = jnp.dot(h2, wf_ref[...], preferred_element_type=jnp.float32) + bf
    o_ref[...] = jax.nn.sigmoid(logits)


def prepare_params(w1, b1, w2, b2, wf, bf):
    """One-time conversion of PyTorch-layout params to kernel layout.
    Call once at init; reuse the result across forward calls (no per-call
    transposes / casts)."""
    w1t = jnp.transpose(w1.reshape(64, 616)).astype(jnp.bfloat16)   # (616, 64)
    w2t = jnp.transpose(w2.reshape(32, 64)).astype(jnp.float32)     # (64, 32)
    wft = jnp.transpose(wf).astype(jnp.float32)                     # (32, 2)
    bias = jnp.zeros((3, 128), jnp.float32)
    bias = bias.at[0, :64].set(b1.astype(jnp.float32))
    bias = bias.at[1, :32].set(b2.astype(jnp.float32))
    bias = bias.at[2, :2].set(bf.astype(jnp.float32))
    return w1t, w2t, wft, bias


def cnn_forward(x, params):
    """x: (B, 616) f32 — a batch of independent samples, each processed with the
    exact per-sample semantics of CNN.forward.  Returns (B, 2) f32."""
    w1t, w2t, wft, bias = params
    B = x.shape[0]
    Bp = ((B + BM - 1) // BM) * BM
    if Bp != B:
        x = jnp.pad(x, ((0, Bp - B), (0, 0)))

    flops = 2 * Bp * (616 * 64 + 64 * 32 + 32 * 2)
    bytes_accessed = (Bp * 616 * 4            # x
                      + 616 * 64 * 2          # w1 (bf16)
                      + 64 * 32 * 4 + 32 * 2 * 4 + 3 * 128 * 4
                      + Bp * 2 * 4)           # out

    out = pl.pallas_call(
        cnn_kernel,
        out_shape=jax.ShapeDtypeStruct((Bp, 2), jnp.float32),
        grid=(Bp // BM,),
        in_specs=[
            pl.BlockSpec((BM, 616), lambda i: (i, 0)),   # x: new tile per step
            pl.BlockSpec((616, 64), lambda i: (0, 0)),   # weights: resident
            pl.BlockSpec((64, 32), lambda i: (0, 0)),
            pl.BlockSpec((32, 2), lambda i: (0, 0)),
            pl.BlockSpec((3, 128), lambda i: (0, 0)),    # packed biases
        ],
        out_specs=pl.BlockSpec((BM, 2), lambda i: (i, 0)),
        compiler_params=pltpu.CompilerParams(
            dimension_semantics=("parallel",)),
        cost_estimate=pl.CostEstimate(
            flops=flops, transcendentals=2 * Bp, bytes_accessed=bytes_accessed),
    )(x, w1t, w2t, wft, bias)

    if Bp != B:
        out = out[:B]
    return out


if __name__ == "__main__":
    key = jax.random.PRNGKey(0)
    kx, k1, k2, k3, k4, k5, k6 = jax.random.split(key, 7)

    # Batch of samples, each the (1, 616) row the module expects (H=1, W=616).
    B = 256
    x = jax.random.normal(kx, (B, 616), dtype=jnp.float32)

    # Deterministic synthetic parameters (PyTorch-layout shapes from __init__).
    w1 = jax.random.normal(k1, (64, 1, 1, 616), dtype=jnp.float32) * 0.05
    b1 = jax.random.normal(k2, (64,), dtype=jnp.float32) * 0.05
    w2 = jax.random.normal(k3, (32, 64, 1, 1), dtype=jnp.float32) * 0.1
    b2 = jax.random.normal(k4, (32,), dtype=jnp.float32) * 0.1
    wf = jax.random.normal(k5, (2, 32), dtype=jnp.float32) * 0.1
    bf = jax.random.normal(k6, (2,), dtype=jnp.float32) * 0.1

    params = prepare_params(w1, b1, w2, b2, wf, bf)   # one-time layout prep

    out = jax.block_until_ready(cnn_forward(x, params))
    assert out.shape == (B, 2)

    # Reference 1: same numerics as the kernel (bf16 first matmul, f32 accum).
    xb = x.astype(jnp.bfloat16)
    w1b = jnp.transpose(w1.reshape(64, 616)).astype(jnp.bfloat16)
    h1 = jnp.maximum(
        jnp.dot(xb, w1b, preferred_element_type=jnp.float32) + b1[None, :], 0.0)
    h2 = jnp.maximum(
        jnp.dot(h1, jnp.transpose(w2.reshape(32, 64)),
                preferred_element_type=jnp.float32) + b2[None, :], 0.0)
    ref = jax.nn.sigmoid(
        jnp.dot(h2, wf.T, preferred_element_type=jnp.float32) + bf[None, :])
    assert jnp.allclose(out, ref, atol=1e-4, rtol=1e-4), \
        float(jnp.max(jnp.abs(out - ref)))

    # Reference 2: full-f32 module math (semantic check, bf16 weight tolerance).
    rh1 = jnp.maximum(x @ w1.reshape(64, 616).T + b1, 0.0)
    rh2 = jnp.maximum(rh1 @ w2.reshape(32, 64).T + b2, 0.0)
    ref_f32 = jax.nn.sigmoid(rh2 @ wf.T + bf)
    assert jnp.allclose(out, ref_f32, atol=2e-2), \
        float(jnp.max(jnp.abs(out - ref_f32)))

    # Single-sample path (original unbatched module semantics, exercises padding).
    out1 = jax.block_until_ready(cnn_forward(x[:1], params))
    assert out1.shape == (1, 2)
    assert jnp.allclose(out1, out[:1], atol=1e-6)

    print("KERNEL_OK")
</pallas_src>

<mosaic_0001>
module attributes {stable_mosaic.version = 11 : i64} {
  func.func @cnn_kernel(%arg0: i32, %arg1: memref<128x616xf32, #tpu.memory_space<vmem>>, %arg2: memref<616x64xbf16, #tpu.memory_space<vmem>>, %arg3: memref<64x32xf32, #tpu.memory_space<vmem>>, %arg4: memref<32x2xf32, #tpu.memory_space<vmem>>, %arg5: memref<3x128xf32, #tpu.memory_space<vmem>>, %arg6: memref<128x2xf32, #tpu.memory_space<vmem>>) attributes {dimension_semantics = [#tpu.dimension_semantics<parallel>], iteration_bounds = array<i64: 2>, scalar_prefetch = 0 : i64, scratch_operands = 0 : i64, tpu.core_type = #tpu.core_type<tc>, window_params = [{transform_indices = @transform_0, window_bounds = array<i64: 128, 616>}, {pipeline_mode = #tpu.pipeline_mode<synchronous>, transform_indices = @transform_1, window_bounds = array<i64: 616, 64>}, {pipeline_mode = #tpu.pipeline_mode<synchronous>, transform_indices = @transform_2, window_bounds = array<i64: 64, 32>}, {pipeline_mode = #tpu.pipeline_mode<synchronous>, transform_indices = @transform_3, window_bounds = array<i64: 32, 2>}, {pipeline_mode = #tpu.pipeline_mode<synchronous>, transform_indices = @transform_4, window_bounds = array<i64: 3, 128>}, {transform_indices = @transform_5, window_bounds = array<i64: 128, 2>}]} {
    %c0 = arith.constant 0 : index
    %c0_0 = arith.constant 0 : index
    %0 = vector.load %arg1[%c0, %c0_0] : memref<128x616xf32, #tpu.memory_space<vmem>>, vector<128x616xf32>
    %1 = arith.truncf %0 : vector<128x616xf32> to vector<128x616xbf16>
    %c0_1 = arith.constant 0 : index
    %c0_2 = arith.constant 0 : index
    %2 = vector.load %arg5[%c0_1, %c0_2] : memref<3x128xf32, #tpu.memory_space<vmem>>, vector<1x64xf32>
    %c1 = arith.constant 1 : index
    %c0_3 = arith.constant 0 : index
    %3 = vector.load %arg5[%c1, %c0_3] : memref<3x128xf32, #tpu.memory_space<vmem>>, vector<1x32xf32>
    %c2 = arith.constant 2 : index
    %c0_4 = arith.constant 0 : index
    %4 = vector.load %arg5[%c2, %c0_4] : memref<3x128xf32, #tpu.memory_space<vmem>>, vector<1x2xf32>
    %c0_5 = arith.constant 0 : index
    %c0_6 = arith.constant 0 : index
    %5 = vector.load %arg2[%c0_5, %c0_6] : memref<616x64xbf16, #tpu.memory_space<vmem>>, vector<616x64xbf16>
    %cst = arith.constant dense<0.000000e+00> : vector<128x64xf32>
    %6 = tpu.matmul %1, %5, %cst {dimension_numbers = #tpu.dot_dimension_numbers<[1], [0], [0], [1], [0, 0, 1, 1], [], []>} : vector<128x616xbf16>, vector<616x64xbf16>, vector<128x64xf32> -> vector<128x64xf32>
    %7 = vector.broadcast %2 : vector<1x64xf32> to vector<128x64xf32>
    %8 = arith.addf %6, %7 : vector<128x64xf32>
    %cst_7 = arith.constant 0.000000e+00 : f32
    %9 = vector.broadcast %cst_7 : f32 to vector<128x64xf32>
    %10 = arith.maximumf %8, %9 : vector<128x64xf32>
    %c0_8 = arith.constant 0 : index
    %c0_9 = arith.constant 0 : index
    %11 = vector.load %arg3[%c0_8, %c0_9] : memref<64x32xf32, #tpu.memory_space<vmem>>, vector<64x32xf32>
    %cst_10 = arith.constant dense<0.000000e+00> : vector<128x32xf32>
    %12 = tpu.matmul %10, %11, %cst_10 {dimension_numbers = #tpu.dot_dimension_numbers<[1], [0], [0], [1], [0, 0, 1, 1], [], []>} : vector<128x64xf32>, vector<64x32xf32>, vector<128x32xf32> -> vector<128x32xf32>
    %13 = vector.broadcast %3 : vector<1x32xf32> to vector<128x32xf32>
    %14 = arith.addf %12, %13 : vector<128x32xf32>
    %cst_11 = arith.constant 0.000000e+00 : f32
    %15 = vector.broadcast %cst_11 : f32 to vector<128x32xf32>
    %16 = arith.maximumf %14, %15 : vector<128x32xf32>
    %c0_12 = arith.constant 0 : index
    %c0_13 = arith.constant 0 : index
    %17 = vector.load %arg4[%c0_12, %c0_13] : memref<32x2xf32, #tpu.memory_space<vmem>>, vector<32x2xf32>
    %cst_14 = arith.constant dense<0.000000e+00> : vector<128x2xf32>
    %18 = tpu.matmul %16, %17, %cst_14 {dimension_numbers = #tpu.dot_dimension_numbers<[1], [0], [0], [1], [0, 0, 1, 1], [], []>} : vector<128x32xf32>, vector<32x2xf32>, vector<128x2xf32> -> vector<128x2xf32>
    %19 = vector.broadcast %4 : vector<1x2xf32> to vector<128x2xf32>
    %20 = arith.addf %18, %19 : vector<128x2xf32>
    %21 = arith.negf %20 : vector<128x2xf32>
    %22 = math.exp %21 : vector<128x2xf32>
    %cst_15 = arith.constant 1.000000e+00 : f32
    %23 = vector.broadcast %cst_15 : f32 to vector<128x2xf32>
    %24 = arith.addf %23, %22 : vector<128x2xf32>
    %25 = arith.divf %23, %24 : vector<128x2xf32>
    %c0_16 = arith.constant 0 : index
    %c0_17 = arith.constant 0 : index
    %26 = vector.load %arg6[%c0_16, %c0_17] : memref<128x2xf32, #tpu.memory_space<vmem>>, vector<128x2xf32>
    tpu.vector_store %arg6[%c0_16, %c0_17], %25 {strides = array<i32>} : memref<128x2xf32, #tpu.memory_space<vmem>>, vector<128x2xf32>,
    return
  }
  func.func @transform_0(%arg0: i32) -> (i32, i32) {
    %c0_i32 = arith.constant 0 : i32
    %c0_i32_0 = arith.constant 0 : i32
    return %arg0, %c0_i32 : i32, i32
  }
  func.func @transform_1(%arg0: i32) -> (i32, i32) {
    %c0_i32 = arith.constant 0 : i32
    %c0_i32_0 = arith.constant 0 : i32
    %c0_i32_1 = arith.constant 0 : i32
    return %c0_i32, %c0_i32_0 : i32, i32
  }
  func.func @transform_2(%arg0: i32) -> (i32, i32) {
    %c0_i32 = arith.constant 0 : i32
    %c0_i32_0 = arith.constant 0 : i32
    %c0_i32_1 = arith.constant 0 : i32
    return %c0_i32, %c0_i32_0 : i32, i32
  }
  func.func @transform_3(%arg0: i32) -> (i32, i32) {
    %c0_i32 = arith.constant 0 : i32
    %c0_i32_0 = arith.constant 0 : i32
    %c0_i32_1 = arith.constant 0 : i32
    return %c0_i32, %c0_i32_0 : i32, i32
  }
  func.func @transform_4(%arg0: i32) -> (i32, i32) {
    %c0_i32 = arith.constant 0 : i32
    %c0_i32_0 = arith.constant 0 : i32
    %c0_i32_1 = arith.constant 0 : i32
    return %c0_i32, %c0_i32_0 : i32, i32
  }
  func.func @transform_5(%arg0: i32) -> (i32, i32) {
    %c0_i32 = arith.constant 0 : i32
    %c0_i32_0 = arith.constant 0 : i32
    return %arg0, %c0_i32 : i32, i32
  }
}

</mosaic_0001>

<bundles_post_ra>
// kernel: tpu_custom_call.1
= control target key start
LH: loop header
LB: loop body
LE: loop exit
PB: predicated region body
PF: predicated region fallthrough
CT: control target
= control target key end

     0   :  { %s1984_s18 = smov 0   ;;  %s2484_s0 = inlined_call_operand.vmem [shape: f32[256,616], index: 0, kind: input, shape index: {}]   ;;  %s2485_s1 = inlined_call_operand.vmem [shape: bf16[616,64], index: 1, kind: input, shape index: {}]   ;;  %s2486_s2 = inlined_call_operand.vmem [shape: f32[64,32], index: 2, kind: input, shape index: {}]   ;;  %s2487_s3 = inlined_call_operand.vmem [shape: f32[32,2], index: 3, kind: input, shape index: {}]   ;;  %s2488_s4 = inlined_call_operand.vmem [shape: f32[3,128], index: 4, kind: input, shape index: {}]   ;;  %s2489_s5 = inlined_call_operand.vmem [shape: f32[256,2], index: 5, kind: output, shape index: {}]  }
   0x1 LB: > { %s1589_s19 = sadd.s32 4294967295, %s1952_s18   ;;  %p1593_p0 = scmp.ge.s32.totalorder %s1952_s18, 1  ;;  %s1952_s18 = sphi %s1984_s18, %s15_s18  }
   0x2   : > { %p189_p1 = scmp.lt.s32.totalorder %s1952_s18, 3 }
   0x4   : > { %p190_p2 = pnand %p1593_p0, %p189_p1 }
   0x5   : > { %s1594_s13 = sshll.u32 (!%p190_p2), %s1589_s19, 4 }
   0x6   : > { %193 = sbr.rel (%p190_p2) target bundleno = 690 (0x2b2), region = 40  ;;  %p219_p3 = scmp.lt.s32.totalorder (!%p190_p2), %s1594_s13, 31 }
   0xb   : > { %v1815_v0 = vld [vmem:[%s2485_s1 + $0x38] sm:$0xff]  ;;  %v1814_v3 = vld [vmem:[%s2485_s1 + $0x30] sm:$0xff]  ;;  %v1813_v6 = vld [vmem:[%s2485_s1 + $0x28] sm:$0xff]  ;;  %s2491_s13 = smov (!%p219_p3, %s1594_s13), 31  ;;  %vm689_vm0 = vcmask 1043456   ;;  %vm664_vm1 = vcmask 850944  }
   0xc   : > { %v1998_v1 = vld [vmem:[%s2485_s1 + $0xb8] sm:$0xff]  ;;  %693 = vmatpush.bf16.msra.mxu0 %v1815_v0  ;;  %1846 = vmatpush.bf16.msra.mxu3 %v1815_v0  ;;  %v2013_v4 = vld [vmem:[%s2485_s1 + $0xb0] sm:$0xff]  ;;  %v2028_v7 = vld [vmem:[%s2485_s1 + $0xa8] sm:$0xff]  ;;  %s1870_s29 = smul.u32 40, %s2491_s13  ;;  %vm963_vm2 = vcmask 523264   ;;  %vm1098_vm3 = vcmask 261120  }
   0xd   : > { %v2003_v2 = vld [vmem:[%s2485_s1 + $0x78] sm:$0xff]  ;;  %1862 = vmatpush.bf16.msra.mxu2 %v1998_v1  ;;  %v2018_v5 = vld [vmem:[%s2485_s1 + $0x70] sm:$0xff]  ;;  %v2033_v8 = vld [vmem:[%s2485_s1 + $0x68] sm:$0xff]  ;;  %s1597_s20 = sshll.u32 %s2491_s13, 3  ;;  %vm1516_vm7 = vcmask 15360  }
   0xe   : > { %1854 = vmatpush.bf16.msra.mxu1 %v2003_v2  ;;  %v1812_v9 = vld [vmem:[%s2485_s1 + $0x20] sm:$0xff]  ;;  %v1811_v12 = vld [vmem:[%s2485_s1 + $0x18] sm:$0xff]  ;;  %v1810_v15 = vld [vmem:[%s2485_s1 + $0x10] sm:$0xff]  ;;  %s2089_s14 = scalar_lea.vmem %s2484_s0, %s1870_s29  ;;  %s2435_s22 = scalar_lea.vmem %s2489_s5, %s1597_s20 }
   0xf   : > { %v2043_v10 = vld [vmem:[%s2485_s1 + $0xa0] sm:$0xff]  ;;  %v2060_v13 = vld [vmem:[%s2485_s1 + $0x98] sm:$0xff]  ;;  %v2076_v16 = vld [vmem:[%s2485_s1 + $0x90] sm:$0xff] }
  0x10   : > { %694 = vmatpush.bf16.msra.mxu0 %v1814_v3  ;;  %1847 = vmatpush.bf16.msra.mxu3 %v1814_v3  ;;  %v2048_v11 = vld [vmem:[%s2485_s1 + $0x60] sm:$0xff]  ;;  %v2065_v14 = vld [vmem:[%s2485_s1 + $0x58] sm:$0xff]  ;;  %v2081_v17 = vld [vmem:[%s2485_s1 + $0x50] sm:$0xff] }
  0x11   : > { %1863 = vmatpush.bf16.msra.mxu2 %v2013_v4  ;;  %v1809_v18 = vld [vmem:[%s2485_s1 + $0x8] sm:$0xff]  ;;  %v1808_v21 = vld [vmem:[%s2485_s1] sm:$0xff]  ;;  %v1839_v26 = vld [vmem:[%s2485_s1 + $0xf8] sm:$0xff] }
  0x12   : > { %1855 = vmatpush.bf16.msra.mxu1 %v2018_v5  ;;  %v2096_v19 = vld [vmem:[%s2485_s1 + $0x88] sm:$0xff]  ;;  %v232_v22 = vld [vmem:[%s2089_s14] sm:$0xff]  ;;  %v254_v28 = vld [vmem:[%s2089_s14 + $0xb0] sm:$0xff] }
  0x13   : > { %v1817_v20 = vld [vmem:[%s2485_s1 + $0x48] sm:$0xff]  ;;  %v252_v24 = vld [vmem:[%s2089_s14 + $0xa0] sm:$0xff]  ;;  %v259_v29 = vld [vmem:[%s2089_s14 + $0xd8] sm:$0xff] }
  0x14   : > { %695 = vmatpush.bf16.msra.mxu0 %v1813_v6  ;;  %1848 = vmatpush.bf16.msra.mxu3 %v1813_v6  ;;  %v237_v23 = vld [vmem:[%s2089_s14 + $0x28] sm:$0xff]  ;;  %v2115_v27 = vld [vmem:[%s2485_s1 + $0x80] sm:$0xff]  ;;  %v258_v34 = vld [vmem:[%s2089_s14 + $0xd0] sm:$0xff]  ;;  %v324_v35 = vpack.c.bf16 %v259_v29, %v254_v28 }
  0x15   : > { %1864 = vmatpush.bf16.msra.mxu2 %v2028_v7  ;;  %v257_v25 = vld [vmem:[%s2089_s14 + $0xc8] sm:$0xff]  ;;  %v1816_v30 = vld [vmem:[%s2485_s1 + $0x40] sm:$0xff]  ;;  %v312_v31 = vpack.c.bf16 %v237_v23, %v232_v22  ;;  %v1838_v37 = vld [vmem:[%s2485_s1 + $0xf0] sm:$0xff] }
  0x16   : > { %1856 = vmatpush.bf16.msra.mxu1 %v2033_v8  ;;  %v322_v32 = vpack.c.bf16 %v257_v25, %v252_v24  ;;  %v253_v33 = vld [vmem:[%s2089_s14 + $0xa8] sm:$0xff]  ;;  %v1836_v39 = vld [vmem:[%s2485_s1 + $0xe0] sm:$0xff]  ;;  %v242_v40 = vld [vmem:[%s2089_s14 + $0x50] sm:$0xff] }
  0x17   : > { %v323_v36 = vpack.c.bf16 %v258_v34, %v253_v33  ;;  %v1837_v38 = vld [vmem:[%s2485_s1 + $0xe8] sm:$0xff]  ;;  %v247_v41 = vld [vmem:[%s2089_s14 + $0x78] sm:$0xff]  ;;  %v262_v42 = vld [vmem:[%s2089_s14 + $0xf0] sm:$0xff] }
  0x18   : > { %696 = vmatpush.bf16.msra.mxu0 %v1812_v9  ;;  %1849 = vmatpush.bf16.msra.mxu3 %v1812_v9  ;;  %v267_v43 = vld [vmem:[%s2089_s14 + $0x118] sm:$0xff]  ;;  %v264_v44 = vld [vmem:[%s2089_s14 + $0x100] sm:$0xff]  ;;  %v269_v45 = vld [vmem:[%s2089_s14 + $0x128] sm:$0xff]  ;;  %v317_v46 = vpack.c.bf16 %v247_v41, %v242_v40 }
  0x19   : > { %1865 = vmatpush.bf16.msra.mxu2 %v2043_v10  ;;  %v327_v47 = vpack.c.bf16 %v267_v43, %v262_v42  ;;  %v263_v48 = vld [vmem:[%s2089_s14 + $0xf8] sm:$0xff]  ;;  %v268_v49 = vld [vmem:[%s2089_s14 + $0x120] sm:$0xff]  ;;  %v329_v50 = vpack.c.bf16 %v269_v45, %v264_v44  ;;  %v1834_v53 = vld [vmem:[%s2485_s1 + $0xd0] sm:$0xff] }
  0x1a   : > { %1857 = vmatpush.bf16.msra.mxu1 %v2048_v11  ;;  %v328_v51 = vpack.c.bf16 %v268_v49, %v263_v48  ;;  %v1835_v52 = vld [vmem:[%s2485_s1 + $0xd8] sm:$0xff]  ;;  %v272_v54 = vld [vmem:[%s2089_s14 + $0x140] sm:$0xff]  ;;  %v277_v55 = vld [vmem:[%s2089_s14 + $0x168] sm:$0xff] }
  0x1b   : > { %v233_v56 = vld [vmem:[%s2089_s14 + $0x8] sm:$0xff]  ;;  %v238_v57 = vld [vmem:[%s2089_s14 + $0x30] sm:$0xff]  ;;  %v279_v59 = vld [vmem:[%s2089_s14 + $0x178] sm:$0xff]  ;;  %v332_v60 = vpack.c.bf16 %v277_v55, %v272_v54 }
  0x1c   : > { %697 = vmatpush.bf16.msra.mxu0 %v1811_v12  ;;  %1850 = vmatpush.bf16.msra.mxu3 %v1811_v12  ;;  %v274_v58 = vld [vmem:[%s2089_s14 + $0x150] sm:$0xff]  ;;  %v313_v61 = vpack.c.bf16 %v238_v57, %v233_v56  ;;  %v273_v62 = vld [vmem:[%s2089_s14 + $0x148] sm:$0xff]  ;;  %v248_v6 = vld [vmem:[%s2089_s14 + $0x80] sm:$0xff] }
  0x1d   : > { %1866 = vmatpush.bf16.msra.mxu2 %v2060_v13  ;;  %v278_v63 = vld [vmem:[%s2089_s14 + $0x170] sm:$0xff]  ;;  %v334_v0 = vpack.c.bf16 %v279_v59, %v274_v58  ;;  %v284_v9 = vld [vmem:[%s2089_s14 + $0x1a0] sm:$0xff]  ;;  %v1845_v22 = vld [vmem:[%s2485_s1 + $0x128] sm:$0xff] }
  0x1e   : > { %1858 = vmatpush.bf16.msra.mxu1 %v2065_v14  ;;  %v282_v3 = vld [vmem:[%s2089_s14 + $0x190] sm:$0xff]  ;;  %v297_v23 = vld [vmem:[%s2089_s14 + $0x208] sm:$0xff]  ;;  %v239_v25 = vld [vmem:[%s2089_s14 + $0x38] sm:$0xff] }
  0x1f   : > { %v234_v24 = vld [vmem:[%s2089_s14 + $0x10] sm:$0xff]  ;;  %v299_v28 = vld [vmem:[%s2089_s14 + $0x218] sm:$0xff]  ;;  %v1841_v40 = vld [vmem:[%s2485_s1 + $0x108] sm:$0xff] }
  0x20   : > { %698 = vmatpush.bf16.msra.mxu0 %v1810_v15  ;;  %1851 = vmatpush.bf16.msra.mxu3 %v1810_v15  ;;  %v288_v15 = vld [vmem:[%s2089_s14 + $0x1c0] sm:$0xff]  ;;  %v1843_v34 = vld [vmem:[%s2485_s1 + $0x118] sm:$0xff]  ;;  %v309_v42 = vld [vmem:[%s2089_s14 + $0x268] sm:$0xff] }
  0x21   : > { %1867 = vmatpush.bf16.msra.mxu2 %v2076_v16  ;;  %v304_v41 = vld [vmem:[%s2089_s14 + $0x240] sm:$0xff]  ;;  %v303_v45 = vld [vmem:[%s2089_s14 + $0x238] sm:$0xff]  ;;  %v245_v56 = vld [vmem:[%s2089_s14 + $0x68] sm:$0xff] }
  0x22   : > { %1859 = vmatpush.bf16.msra.mxu1 %v2081_v17  ;;  %v349_v48 = vpack.c.bf16 %v309_v42, %v304_v41  ;;  %v961_v57 = vld [vmem:[%s2486_s2 + $0x38] sm:$0xff]  ;;  %v250_v58 = vld [vmem:[%s2089_s14 + $0x90] sm:$0xff]  ;;  %v955_v41 = vld [vmem:[%s2486_s2 + $0x8] sm:$0xff] }
  0x23   : > { %v246_v59 = vld [vmem:[%s2089_s14 + $0x70] sm:$0xff] }
  0x24   : > { %699 = vmatpush.bf16.msra.mxu0 %v1809_v18  ;;  %1852 = vmatpush.bf16.msra.mxu3 %v1809_v18 }
  0x25   : > { %1868 = vmatpush.bf16.msra.mxu2 %v2096_v19 }
  0x26   : > { %1860 = vmatpush.bf16.msra.mxu1 %v1817_v20 }
  0x28   : > { %700 = vmatpush.bf16.msra.mxu0 %v1808_v21  ;;  %1853 = vmatpush.bf16.msra.mxu3 %v1808_v21  ;;  %v292_v21 = vld [vmem:[%s2089_s14 + $0x1e0] sm:$0xff] }
  0x29   : > { %1869 = vmatpush.bf16.msra.mxu2 %v2115_v27  ;;  %v342_v29 = vpack.c.bf16 %v297_v23, %v292_v21  ;;  %v957_v23 = vld [vmem:[%s2486_s2 + $0x18] sm:$0xff] }
  0x2a   : > { %1861 = vmatpush.bf16.msra.mxu1 %v1816_v30 }
  0x2b   : > { %701 = vmatmul.bf16.vlgmr.msra.gmra.mxu0 %v312_v31  ;;  %711 = vmatmul.bf16.vlgmr.msra.gmra.mxu3 %v322_v32  ;;  %v298_v31 = vld [vmem:[%s2089_s14 + $0x210] sm:$0xff] }
  0x2c   : > { %840 = vmatpush.bf16.msrb.mxu3 %v1839_v26  ;;  %742 = vmatpush.bf16.msrb.mxu0 %v2003_v2  ;;  %v333_v2 = vpack.c.bf16 %v278_v63, %v273_v62  ;;  %v294_v26 = vld [vmem:[%s2089_s14 + $0x1f0] sm:$0xff] }
  0x2d   : > { %809 = vmatmul.bf16.vlgmr.msra.gmra.mxu2 %v324_v35  ;;  %760 = vmatmul.bf16.vlgmr.msra.gmra.mxu1 %v323_v36  ;;  %v344_v32 = vpack.c.bf16 %v299_v28, %v294_v26  ;;  %v1842_v35 = vld [vmem:[%s2485_s1 + $0x110] sm:$0xff]  ;;  %v281_v26 = vld [vmem:[%s2089_s14 + $0x188] sm:$0xff] }
  0x2e   : > { %v302_v36 = vld [vmem:[%s2089_s14 + $0x230] sm:$0xff]  ;;  %1020 = vmatpush.msrb.mxu1 %v961_v57 }
  0x2f   : > { %v960_v63 = vld [vmem:[%s2486_s2 + $0x30] sm:$0xff] }
  0x30   : > { %743 = vmatpush.bf16.msrb.mxu0 %v2018_v5  ;;  %841 = vmatpush.bf16.msrb.mxu3 %v1838_v37  ;;  %v243_v5 = vld [vmem:[%s2089_s14 + $0x58] sm:$0xff]  ;;  %v306_v57 = vld [vmem:[%s2089_s14 + $0x250] sm:$0xff] }
  0x31   : > { %v318_v12 = vpack.c.bf16 %v248_v6, %v243_v5  ;;  %v307_v37 = vld [vmem:[%s2089_s14 + $0x258] sm:$0xff]  ;;  %1021 = vmatpush.msrb.mxu1 %v960_v63 }
  0x32   : > { %v347_v43 = vpack.c.bf16 %v307_v37, %v302_v36  ;;  %v291_v36 = vld [vmem:[%s2089_s14 + $0x1d8] sm:$0xff] }
  0x34   : > { %744 = vmatpush.bf16.msrb.mxu0 %v2033_v8  ;;  %842 = vmatpush.bf16.msrb.mxu3 %v1837_v38  ;;  %v431_v8 = vld [vmem:[%s2485_s1 + $0x130] sm:$0xf]  ;;  %v244_v38 = vld [vmem:[%s2089_s14 + $0x60] sm:$0xff] }
  0x38   : > { %745 = vmatpush.bf16.msrb.mxu0 %v2048_v11  ;;  %843 = vmatpush.bf16.msrb.mxu3 %v1836_v39  ;;  %v289_v11 = vld [vmem:[%s2089_s14 + $0x1c8] sm:$0xff] }
  0x39   : > { %v339_v18 = vpack.c.bf16 %v289_v11, %v284_v9  ;;  %v249_v39 = vld [vmem:[%s2089_s14 + $0x88] sm:$0xff] }
  0x3a   : > { %v319_v44 = vpack.c.bf16 %v249_v39, %v244_v38 }
  0x3b   : > { %706 = vmatmul.bf16.gmra.mxu0 %v317_v46  ;;  %716 = vmatmul.bf16.gmra.mxu3 %v327_v47  ;;  %v308_v46 = vld [vmem:[%s2089_s14 + $0x260] sm:$0xff] }
  0x3c   : > { %746 = vmatpush.bf16.msrb.mxu0 %v2065_v14  ;;  %844 = vmatpush.bf16.msrb.mxu3 %v1835_v52  ;;  %v283_v14 = vld [vmem:[%s2089_s14 + $0x198] sm:$0xff]  ;;  %v1840_v47 = vld [vmem:[%s2485_s1 + $0x100] sm:$0xff]  ;;  %v348_v49 = vpack.c.bf16 %v308_v46, %v303_v45 }
  0x3d   : > { %814 = vmatmul.bf16.gmra.mxu2 %v329_v50  ;;  %765 = vmatmul.bf16.gmra.mxu1 %v328_v51  ;;  %v235_v50 = vld [vmem:[%s2089_s14 + $0x18] sm:$0xff]  ;;  %v240_v51 = vld [vmem:[%s2089_s14 + $0x40] sm:$0xff] }
  0x3e   : > { %v236_v52 = vld [vmem:[%s2089_s14 + $0x20] sm:$0xff]  ;;  %v315_v54 = vpack.c.bf16 %v240_v51, %v235_v50 }
  0x3f   : > { %v300_v45 = vld [vmem:[%s2089_s14 + $0x220] sm:$0xff] }
  0x40   : > { %747 = vmatpush.bf16.msrb.mxu0 %v2081_v17  ;;  %845 = vmatpush.bf16.msrb.mxu3 %v1834_v53  ;;  %v586_v17 = vunpack.c.l.b16 %v431_v8  ;;  %v241_v53 = vld [vmem:[%s2089_s14 + $0x48] sm:$0xff]  ;;  %v296_v46 = vld [vmem:[%s2089_s14 + $0x200] sm:$0xff] }
  0x41   : > { %v316_v55 = vpack.c.bf16 %v241_v53, %v236_v52  ;;  %v959_v8 = vld [vmem:[%s2486_s2 + $0x28] sm:$0xff]  ;;  %v954_v52 = vld [vmem:[%s2486_s2] sm:$0xff] }
  0x42   : > { %1022 = vmatpush.msrb.mxu1 %v959_v8 }
  0x44   : > { %748 = vmatpush.bf16.msrb.mxu0 %v1817_v20  ;;  %v625_v20 = vpack.c.b16 %v586_v17, %v586_v17 }
  0x48   : > { %749 = vmatpush.bf16.msrb.mxu0 %v1816_v30  ;;  %v314_v30 = vpack.c.bf16 %v239_v25, %v234_v24  ;;  %v280_v24 = vld [vmem:[%s2089_s14 + $0x180] sm:$0xff] }
  0x49   : > { %v276_v25 = vld [vmem:[%s2089_s14 + $0x160] sm:$0xff] }
  0x4b   : > { %721 = vmatmul.bf16.gmra.mxu3 %v332_v60  ;;  %750 = vmatmul.bf16.vlgmr.msrb.gmra.mxu0 %v313_v61  ;;  %v251_v60 = vld [vmem:[%s2089_s14 + $0x98] sm:$0xff]  ;;  %v320_v61 = vpack.c.bf16 %v250_v58, %v245_v56  ;;  %v310_v56 = vld [vmem:[%s2089_s14 + $0x270] sm:$0xff] }
  0x4c   : > { %791 = vmatpush.bf16.msra.mxu0 %v1998_v1  ;;  %v1833_v1 = vld [vmem:[%s2485_s1 + $0xc8] sm:$0xff]  ;;  %v321_v62 = vpack.c.bf16 %v251_v60, %v246_v59  ;;  %v311_v58 = vld [vmem:[%s2089_s14 + $0x278] sm:$0xff] }
  0x4d   : > { %819 = vmatmul.bf16.gmra.mxu2 %v334_v0  ;;  %770 = vmatmul.bf16.gmra.mxu1 %v333_v2  ;;  %v255_v0 = vld [vmem:[%s2089_s14 + $0xb8] sm:$0xff]  ;;  %v260_v2 = vld [vmem:[%s2089_s14 + $0xe0] sm:$0xff] }
  0x4e   : > { %846 = vmatpush.bf16.msrb.mxu3 %v1833_v1  ;;  %v256_v1 = vld [vmem:[%s2089_s14 + $0xc0] sm:$0xff] }
  0x50   : > { %792 = vmatpush.bf16.msra.mxu0 %v2013_v4  ;;  %v287_v4 = vld [vmem:[%s2089_s14 + $0x1b8] sm:$0xff] }
  0x54   : > { %793 = vmatpush.bf16.msra.mxu0 %v2028_v7  ;;  %v337_v7 = vpack.c.bf16 %v287_v4, %v282_v3  ;;  %v261_v3 = vld [vmem:[%s2089_s14 + $0xe8] sm:$0xff]  ;;  %v325_v4 = vpack.c.bf16 %v260_v2, %v255_v0 }
  0x55   : > { %v326_v5 = vpack.c.bf16 %v261_v3, %v256_v1  ;;  %v2322_v1 = vld [vmem:[%s2488_s4] ss:$0 sm:$0xff] }
  0x58   : > { %794 = vmatpush.bf16.msra.mxu0 %v2043_v10  ;;  %v338_v10 = vpack.c.bf16 %v288_v15, %v283_v14  ;;  %v266_v14 = vld [vmem:[%s2089_s14 + $0x110] sm:$0xff]  ;;  %v271_v15 = vld [vmem:[%s2089_s14 + $0x138] sm:$0xff] }
  0x5b   : > { %726 = vmatmul.bf16.gmra.mxu3 %v337_v7  ;;  %755 = vmatmul.bf16.gmra.mxu0 %v318_v12  ;;  %v265_v7 = vld [vmem:[%s2089_s14 + $0x108] sm:$0xff]  ;;  %v270_v12 = vld [vmem:[%s2089_s14 + $0x130] sm:$0xff] }
  0x5c   : > { %795 = vmatpush.bf16.msra.mxu0 %v2060_v13  ;;  %v1832_v13 = vld [vmem:[%s2485_s1 + $0xc0] sm:$0xff] }
  0x5d   : > { %824 = vmatmul.bf16.gmra.mxu2 %v339_v18  ;;  %775 = vmatmul.bf16.gmra.mxu1 %v338_v10  ;;  %v330_v18 = vpack.c.bf16 %v270_v12, %v265_v7  ;;  %v331_v10 = vpack.c.bf16 %v271_v15, %v266_v14 }
  0x5e   : > { %847 = vmatpush.bf16.msrb.mxu3 %v1832_v13  ;;  %v958_v13 = vld [vmem:[%s2486_s2 + $0x20] sm:$0xff] }
  0x5f   : > { %1023 = vmatpush.msrb.mxu1 %v958_v13 }
  0x60   : > { %796 = vmatpush.bf16.msra.mxu0 %v2076_v16  ;;  %v691_v16 = vsel %vm689_vm0, %v625_v20, 0 }
  0x61   : > { %1024 = vmatpush.msrb.mxu1 %v957_v23 }
  0x64   : > { %797 = vmatpush.bf16.msra.mxu0 %v2096_v19  ;;  %v293_v19 = vld [vmem:[%s2089_s14 + $0x1e8] sm:$0xff] }
  0x65   : > { %v343_v33 = vpack.c.bf16 %v298_v31, %v293_v19 }
  0x68   : > { %798 = vmatpush.bf16.msra.mxu0 %v2115_v27  ;;  %v1844_v27 = vld [vmem:[%s2485_s1 + $0x120] sm:$0xff] }
  0x6b   : > { %731 = vmatmul.bf16.gmra.mxu3 %v342_v29  ;;  %799 = vmatmul.bf16.vlgmr.msra.gmra.mxu0 %v314_v30  ;;  %v336_v30 = vpack.c.bf16 %v281_v26, %v276_v25 }
  0x6c   : > { %890 = vmatpush.bf16.msrb.mxu0 %v691_v16 }
  0x6d   : > { %829 = vmatmul.bf16.gmra.mxu2 %v344_v32  ;;  %780 = vmatmul.bf16.gmra.mxu1 %v343_v33  ;;  %v956_v32 = vld [vmem:[%s2486_s2 + $0x10] sm:$0xff]  ;;  %v285_v33 = vld [vmem:[%s2089_s14 + $0x1a8] sm:$0xff] }
  0x6e   : > { %1025 = vmatpush.msrb.mxu1 %v956_v32 }
  0x70   : > { %891 = vmatpush.bf16.msrb.mxu0 %v1845_v22  ;;  %v275_v22 = vld [vmem:[%s2089_s14 + $0x158] sm:$0xff]  ;;  %1026 = vmatpush.msrb.mxu1 %v955_v41 }
  0x71   : > { %v335_v29 = vpack.c.bf16 %v280_v24, %v275_v22 }
  0x72   : > { %1027 = vmatpush.msrb.mxu1 %v954_v52 }
  0x74   : > { %892 = vmatpush.bf16.msrb.mxu0 %v1844_v27 }
  0x78   : > { %893 = vmatpush.bf16.msrb.mxu0 %v1843_v34  ;;  %v290_v34 = vld [vmem:[%s2089_s14 + $0x1d0] sm:$0xff] }
  0x79   : > { %v340_v38 = vpack.c.bf16 %v290_v34, %v285_v33 }
  0x7b   : > { %736 = vmatmul.bf16.gmra.mxu3 %v347_v43  ;;  %804 = vmatmul.bf16.gmra.mxu0 %v319_v44  ;;  %v295_v44 = vld [vmem:[%s2089_s14 + $0x1f8] sm:$0xff] }
  0x7c   : > { %894 = vmatpush.bf16.msrb.mxu0 %v1842_v35  ;;  %v286_v35 = vld [vmem:[%s2089_s14 + $0x1b0] sm:$0xff] }
  0x7d   : > { %834 = vmatmul.bf16.gmra.mxu2 %v349_v48  ;;  %785 = vmatmul.bf16.gmra.mxu1 %v348_v49  ;;  %v341_v39 = vpack.c.bf16 %v291_v36, %v286_v35  ;;  %v345_v49 = vpack.c.bf16 %v300_v45, %v295_v44 }
  0x80   : > { %895 = vmatpush.bf16.msrb.mxu0 %v1841_v40 }
  0x84   : > { %896 = vmatpush.bf16.msrb.mxu0 %v1840_v47  ;;  %v301_v47 = vld [vmem:[%s2089_s14 + $0x228] sm:$0xff] }
  0x85   : > { %v346_v50 = vpack.c.bf16 %v301_v47, %v296_v46 }
  0x8b   : > { %848 = vmatmul.bf16.vlgmr.msrb.gmra.mxu3 %v315_v54  ;;  %1750 = vmatmul.msk.bf16.vlgmr.msrb.gmra.mxu0 %vm664_vm1, %v316_v55  ;;  %v305_v55 = vld [vmem:[%s2089_s14 + $0x248] sm:$0xff] }
  0x8c   : > { %v350_v60 = vpack.c.bf16 %v310_v56, %v305_v55 }
  0x9b   : > { %853 = vmatmul.bf16.gmra.mxu3 %v320_v61  ;;  %1751 = vmatmul.msk.bf16.gmra.mxu0 %vm664_vm1, %v321_v62  ;;  %v351_v61 = vpack.c.bf16 %v311_v58, %v306_v57 }
  0xa8   : > { %v2241_v6 = vpop.f32.mrf.mxu0 }
  0xaa   : > { %v761_v12 = vpop.f32.mrf.mxu1 }
  0xab   : > { %858 = vmatmul.bf16.gmra.mxu3 %v325_v4  ;;  %1752 = vmatmul.msk.bf16.gmra.mxu0 %vm664_vm1, %v326_v5  ;;  %v703_v4 = vadd.f32 %v2322_v1, %v2241_v6 }
  0xae   : > { %v2247_v9 = vpop.f32.mrf.mxu3 }
  0xaf   : > { %v713_v45 = vadd.f32 %v2322_v1, %v2247_v9 }
  0xb0   : > { %v2249_v11 = vpop.f32.mrf.mxu0  ;;  %v810_v23 = vpop.f32.mrf.mxu2 }
  0xb1   : > { %v762_v52 = vadd.f32 %v761_v12, %v713_v45 }
  0xb3   : > { %v811_v56 = vadd.f32 %v810_v23, %v762_v52 }
  0xb6   : > { %v2255_v17 = vpop.f32.mrf.mxu3 }
  0xb8   : > { %v2257_v20 = vpop.f32.mrf.mxu0  ;;  %v812_v34 = vpop.f32.mrf.mxu2 }
  0xbb   : > { %863 = vmatmul.bf16.gmra.mxu3 %v330_v18  ;;  %1753 = vmatmul.msk.bf16.gmra.mxu0 %vm664_vm1, %v331_v10  ;;  %v705_v18 = vadd.f32 %v2322_v1, %v2249_v11  ;;  %v1096_v11 = vld [vmem:[%s2487_s3 + $0x18] sm:$0xff] }
  0xbc   : > { %1159 = vmatpush.msrb.mxu2 %v1096_v11 }
  0xbe   : > { %v2263_v16 = vpop.f32.mrf.mxu3 }
  0xc0   : > { %v2265_v21 = vpop.f32.mrf.mxu0 }
  0xc6   : > { %v2274_v28 = vpop.f32.mrf.mxu3 }
  0xc8   : > { %v751_v19 = vpop.f32.mrf.mxu0 }
  0xc9   : > { %v752_v5 = vadd.f32 %v751_v19, %v703_v4 }
  0xcb   : > { %868 = vmatmul.bf16.gmra.mxu3 %v335_v29  ;;  %1754 = vmatmul.msk.bf16.gmra.mxu0 %vm664_vm1, %v336_v30  ;;  %v708_v29 = vadd.f32 %v2322_v1, %v2257_v20  ;;  %v763_v30 = vpop.f32.mrf.mxu1 }
  0xce   : > { %v2277_v31 = vpop.f32.mrf.mxu3 }
  0xd0   : > { %v753_v27 = vpop.f32.mrf.mxu0 }
  0xd1   : > { %v754_v13 = vadd.f32 %v753_v27, %v705_v18 }
  0xd3   : > { %v766_v41 = vpop.f32.mrf.mxu1 }
  0xd6   : > { %v2286_v37 = vpop.f32.mrf.mxu3 }
  0xd8   : > { %v756_v40 = vpop.f32.mrf.mxu0 }
  0xd9   : > { %v757_v32 = vadd.f32 %v756_v40, %v708_v29 }
  0xdb   : > { %873 = vmatmul.bf16.gmra.mxu3 %v340_v38  ;;  %1755 = vmatmul.msk.bf16.gmra.mxu0 %vm664_vm1, %v341_v39  ;;  %v710_v39 = vadd.f32 %v2322_v1, %v2265_v21  ;;  %v715_v21 = vadd.f32 %v2322_v1, %v2255_v17  ;;  %v768_v57 = vpop.f32.mrf.mxu1 }
  0xde   : > { %v2292_v42 = vpop.f32.mrf.mxu3 }
  0xe0   : > { %v2294_v43 = vpop.f32.mrf.mxu0 }
  0xe1   : > { %v759_v40 = vadd.f32 %v2294_v43, %v710_v39 }
  0xe6   : > { %v2300_v48 = vpop.f32.mrf.mxu3 }
  0xe8   : > { %v800_v51 = vpop.f32.mrf.mxu0 }
  0xe9   : > { %v801_v8 = vadd.f32 %v800_v51, %v752_v5  ;;  %v718_v5 = vadd.f32 %v2322_v1, %v2263_v16 }
  0xeb   : > { %878 = vmatmul.bf16.gmra.mxu3 %v345_v49  ;;  %1756 = vmatmul.msk.bf16.gmra.mxu0 %vm664_vm1, %v346_v50  ;;  %v815_v50 = vpop.f32.mrf.mxu2 }
  0xee   : > { %v2306_v53 = vpop.f32.mrf.mxu3 }
  0xf0   : > { %v802_v54 = vpop.f32.mrf.mxu0 }
  0xf1   : > { %v803_v24 = vadd.f32 %v802_v54, %v754_v13 }
  0xf6   : > { %v2312_v59 = vpop.f32.mrf.mxu3 }
  0xf8   : > { %v805_v62 = vpop.f32.mrf.mxu0 }
  0xf9   : > { %v806_v27 = vadd.f32 %v805_v62, %v757_v32  ;;  %v817_v62 = vpop.f32.mrf.mxu2 }
  0xfb   : > { %883 = vmatmul.bf16.gmra.mxu3 %v350_v60  ;;  %1757 = vmatmul.msk.bf16.gmra.mxu0 %vm664_vm1, %v351_v61  ;;  %v764_v60 = vadd.f32 %v763_v30, %v715_v21 }
  0xfd   : > { %v813_v4 = vadd.f32 %v812_v34, %v764_v60 }
  0xfe   : > { %v2315_v63 = vpop.f32.mrf.mxu3 }
 0x100   : > { %v807_v0 = vpop.f32.mrf.mxu0 }
 0x101   : > { %v808_v46 = vadd.f32 %v807_v0, %v759_v40 }
 0x106   : > { %v2317_v2 = vpop.f32.mrf.mxu3 }
 0x108   : > { %v898_v3 = vpop.f32.mrf.mxu0 }
 0x10e   : > { %v849_v7 = vpop.f32.mrf.mxu3 }
 0x10f   : > { %v850_v14 = vadd.f32 %v849_v7, %v801_v8  ;;  %v771_v8 = vpop.f32.mrf.mxu1 }
 0x110   : > { %v900_v15 = vpop.f32.mrf.mxu0 }
 0x111   : > { %v899_v10 = vadd.f32 %v898_v3, %v850_v14  ;;  %v1095_v3 = vld [vmem:[%s2487_s3 + $0x10] sm:$0xff]  ;;  %v767_v14 = vadd.f32 %v766_v41, %v718_v5 }
 0x112   : > { %1160 = vmatpush.msrb.mxu2 %v1095_v3 }
 0x113   : > { %v938_v22 = vmax.f32 %v899_v10, 0.0  ;;  %v820_v10 = vpop.f32.mrf.mxu2  ;;  %v816_v13 = vadd.f32 %v815_v50, %v767_v14  ;;  %v728_v50 = vadd.f32 %v2322_v1, %v2292_v42 }
 0x115   : > { %1758 = vmatmul.msk.f32.vlgmr.msrb.gmra.mxu1 %vm963_vm2, %v938_v22  ;;  %v720_v22 = vadd.f32 %v2322_v1, %v2274_v28 }
 0x116   : > { %v851_v25 = vpop.f32.mrf.mxu3 }
 0x117   : > { %v852_v26 = vadd.f32 %v851_v25, %v803_v24  ;;  %v769_v16 = vadd.f32 %v768_v57, %v720_v22  ;;  %v735_v22 = vadd.f32 %v2322_v1, %v2312_v59 }
 0x118   : > { %v903_v6 = vpop.f32.mrf.mxu0 }
 0x119   : > { %v901_v19 = vadd.f32 %v900_v15, %v852_v26  ;;  %v773_v26 = vpop.f32.mrf.mxu1  ;;  %v818_v30 = vadd.f32 %v817_v62, %v769_v16 }
 0x11b   : > { %v939_v33 = vmax.f32 %v901_v19, 0.0  ;;  %v723_v19 = vadd.f32 %v2322_v1, %v2277_v31  ;;  %v822_v32 = vpop.f32.mrf.mxu2 }
 0x11d   : > { %1759 = vmatmul.msk.f32.gmra.mxu1 %vm963_vm2, %v939_v33  ;;  %v772_v28 = vadd.f32 %v771_v8, %v723_v19  ;;  %v733_v8 = vadd.f32 %v2322_v1, %v2306_v53  ;;  %v738_v19 = vadd.f32 %v2322_v1, %v2315_v63 }
 0x11e   : > { %v854_v35 = vpop.f32.mrf.mxu3 }
 0x11f   : > { %v855_v36 = vadd.f32 %v854_v35, %v806_v27  ;;  %v821_v39 = vadd.f32 %v820_v10, %v772_v28 }
 0x120   : > { %v905_v38 = vpop.f32.mrf.mxu0 }
 0x121   : > { %v904_v20 = vadd.f32 %v903_v6, %v855_v36  ;;  %v776_v35 = vpop.f32.mrf.mxu1 }
 0x123   : > { %v940_v44 = vmax.f32 %v904_v20, 0.0  ;;  %v725_v20 = vadd.f32 %v2322_v1, %v2286_v37  ;;  %v825_v40 = vpop.f32.mrf.mxu2  ;;  %v777_v37 = vadd.f32 %v776_v35, %v728_v50  ;;  %v740_v35 = vadd.f32 %v2322_v1, %v2317_v2  ;;  %v2388_v2 = vld [vmem:[%s2488_s4 + $0x1] ss:$0 sm:$0xff] }
 0x125   : > { %1760 = vmatmul.msk.f32.gmra.mxu1 %vm963_vm2, %v940_v44  ;;  %v774_v45 = vadd.f32 %v773_v26, %v725_v20 }
 0x126   : > { %v856_v47 = vpop.f32.mrf.mxu3 }
 0x127   : > { %v857_v49 = vadd.f32 %v856_v47, %v808_v46 }
 0x128   : > { %v908_v51 = vpop.f32.mrf.mxu0 }
 0x129   : > { %v906_v54 = vadd.f32 %v905_v38, %v857_v49  ;;  %v1094_v38 = vld [vmem:[%s2487_s3 + $0x8] sm:$0xff]  ;;  %v823_v49 = vadd.f32 %v822_v32, %v774_v45 }
 0x12a   : > { %1161 = vmatpush.msrb.mxu2 %v1094_v38 }
 0x12b   : > { %v941_v55 = vmax.f32 %v906_v54, 0.0  ;;  %v827_v21 = vpop.f32.mrf.mxu2 }
 0x12d   : > { %1761 = vmatmul.msk.f32.gmra.mxu1 %vm963_vm2, %v941_v55 }
 0x12e   : > { %v859_v43 = vpop.f32.mrf.mxu3 }
 0x12f   : > { %v860_v58 = vadd.f32 %v859_v43, %v811_v56  ;;  %v826_v43 = vadd.f32 %v825_v40, %v777_v37 }
 0x130   : > { %v910_v9 = vpop.f32.mrf.mxu0 }
 0x131   : > { %v909_v61 = vadd.f32 %v908_v51, %v860_v58  ;;  %v778_v51 = vpop.f32.mrf.mxu1  ;;  %v730_v58 = vadd.f32 %v2322_v1, %v2300_v48 }
 0x133   : > { %v942_v0 = vmax.f32 %v909_v61, 0.0  ;;  %v779_v62 = vadd.f32 %v778_v51, %v730_v58  ;;  %v830_v5 = vpop.f32.mrf.mxu2 }
 0x135   : > { %1762 = vmatmul.msk.f32.gmra.mxu1 %vm963_vm2, %v942_v0 }
 0x136   : > { %v861_v17 = vpop.f32.mrf.mxu3 }
 0x137   : > { %v862_v7 = vadd.f32 %v861_v17, %v813_v4  ;;  %v1093_v4 = vld [vmem:[%s2487_s3] sm:$0xff]  ;;  %v828_v17 = vadd.f32 %v827_v21, %v779_v62 }
 0x138   : > { %v913_v12 = vpop.f32.mrf.mxu0  ;;  %1162 = vmatpush.msrb.mxu2 %v1093_v4 }
 0x139   : > { %v911_v15 = vadd.f32 %v910_v9, %v862_v7  ;;  %v781_v60 = vpop.f32.mrf.mxu1 }
 0x13b   : > { %v943_v18 = vmax.f32 %v911_v15, 0.0 }
 0x13d   : > { %1763 = vmatmul.msk.f32.gmra.mxu1 %vm963_vm2, %v943_v18 }
 0x13e   : > { %v864_v23 = vpop.f32.mrf.mxu3 }
 0x13f   : > { %v865_v24 = vadd.f32 %v864_v23, %v816_v13  ;;  %v832_v23 = vpop.f32.mrf.mxu2 }
 0x140   : > { %v915_v25 = vpop.f32.mrf.mxu0 }
 0x141   : > { %v914_v6 = vadd.f32 %v913_v12, %v865_v24  ;;  %v782_v12 = vadd.f32 %v781_v60, %v733_v8  ;;  %v783_v14 = vpop.f32.mrf.mxu1 }
 0x142   : > { %v784_v16 = vadd.f32 %v783_v14, %v735_v22 }
 0x143   : > { %v944_v29 = vmax.f32 %v914_v6, 0.0  ;;  %v831_v13 = vadd.f32 %v830_v5, %v782_v12 }
 0x145   : > { %1764 = vmatmul.msk.f32.gmra.mxu1 %vm963_vm2, %v944_v29 }
 0x146   : > { %v866_v33 = vpop.f32.mrf.mxu3 }
 0x147   : > { %v867_v11 = vadd.f32 %v866_v33, %v818_v30  ;;  %v833_v30 = vadd.f32 %v832_v23, %v784_v16 }
 0x148   : > { %v918_v27 = vpop.f32.mrf.mxu0 }
 0x149   : > { %v916_v34 = vadd.f32 %v915_v25, %v867_v11  ;;  %v786_v26 = vpop.f32.mrf.mxu1  ;;  %v835_v11 = vpop.f32.mrf.mxu2 }
 0x14a   : > { %v787_v59 = vadd.f32 %v786_v26, %v738_v19 }
 0x14b   : > { %v945_v36 = vmax.f32 %v916_v34, 0.0 }
 0x14c   : > { %v836_v34 = vadd.f32 %v835_v11, %v787_v59 }
 0x14d   : > { %1765 = vmatmul.msk.f32.gmra.mxu1 %vm963_vm2, %v945_v36 }
 0x14e   : > { %v869_v31 = vpop.f32.mrf.mxu3 }
 0x14f   : > { %v870_v41 = vadd.f32 %v869_v31, %v821_v39 }
 0x150   : > { %v920_v44 = vpop.f32.mrf.mxu0 }
 0x151   : > { %v919_v46 = vadd.f32 %v918_v27, %v870_v41  ;;  %v788_v36 = vpop.f32.mrf.mxu1  ;;  %v837_v41 = vpop.f32.mrf.mxu2 }
 0x152   : > { %v789_v31 = vadd.f32 %v788_v36, %v740_v35  ;;  %v2425_v35 = vld [vmem:[%s2488_s4 + $0x2] ss:$0 sm:$0xff] }
 0x153   : > { %v946_v47 = vmax.f32 %v919_v46, 0.0 }
 0x155   : > { %1766 = vmatmul.msk.f32.gmra.mxu1 %vm963_vm2, %v946_v47 }
 0x156   : > { %v871_v52 = vpop.f32.mrf.mxu3 }
 0x157   : > { %v872_v54 = vadd.f32 %v871_v52, %v823_v49 }
 0x158   : > { %v923_v55 = vpop.f32.mrf.mxu0 }
 0x159   : > { %v921_v56 = vadd.f32 %v920_v44, %v872_v54  ;;  %v838_v44 = vadd.f32 %v837_v41, %v789_v31 }
 0x15b   : > { %v947_v57 = vmax.f32 %v921_v56, 0.0 }
 0x15d   : > { %1767 = vmatmul.msk.f32.gmra.mxu1 %vm963_vm2, %v947_v57 }
 0x15e   : > { %v874_v9 = vpop.f32.mrf.mxu3 }
 0x15f   : > { %v875_v61 = vadd.f32 %v874_v9, %v826_v43 }
 0x160   : > { %v925_v42 = vpop.f32.mrf.mxu0 }
 0x161   : > { %v924_v0 = vadd.f32 %v923_v55, %v875_v61 }
 0x163   : > { %v948_v3 = vmax.f32 %v924_v0, 0.0 }
 0x165   : > { %1768 = vmatmul.msk.f32.gmra.mxu1 %vm963_vm2, %v948_v3 }
 0x166   : > { %v876_v48 = vpop.f32.mrf.mxu3 }
 0x167   : > { %v877_v7 = vadd.f32 %v876_v48, %v828_v17 }
 0x168   : > { %v928_v18 = vpop.f32.mrf.mxu0 }
 0x169   : > { %v926_v15 = vadd.f32 %v925_v42, %v877_v7 }
 0x16b   : > { %v949_v10 = vmax.f32 %v926_v15, 0.0 }
 0x16d   : > { %1769 = vmatmul.msk.f32.gmra.mxu1 %vm963_vm2, %v949_v10 }
 0x16e   : > { %v879_v24 = vpop.f32.mrf.mxu3 }
 0x16f   : > { %v880_v25 = vadd.f32 %v879_v24, %v831_v13 }
 0x170   : > { %v930_v29 = vpop.f32.mrf.mxu0 }
 0x171   : > { %v929_v53 = vadd.f32 %v928_v18, %v880_v25 }
 0x173   : > { %v950_v6 = vmax.f32 %v929_v53, 0.0 }
 0x175   : > { %1770 = vmatmul.msk.f32.gmra.mxu1 %vm963_vm2, %v950_v6 }
 0x176   : > { %v881_v32 = vpop.f32.mrf.mxu3 }
 0x177   : > { %v882_v33 = vadd.f32 %v881_v32, %v833_v30 }
 0x178   : > { %v933_v38 = vpop.f32.mrf.mxu0 }
 0x179   : > { %v931_v27 = vadd.f32 %v930_v29, %v882_v33 }
 0x17b   : > { %v951_v28 = vmax.f32 %v931_v27, 0.0 }
 0x17d   : > { %1771 = vmatmul.msk.f32.gmra.mxu1 %vm963_vm2, %v951_v28 }
 0x17e   : > { %v884_v39 = vpop.f32.mrf.mxu3 }
 0x17f   : > { %v885_v20 = vadd.f32 %v884_v39, %v836_v34 }
 0x180   : > { %v935_v47 = vpop.f32.mrf.mxu0 }
 0x181   : > { %v934_v63 = vadd.f32 %v933_v38, %v885_v20 }
 0x183   : > { %v952_v40 = vmax.f32 %v934_v63, 0.0 }
 0x185   : > { %1772 = vmatmul.msk.f32.gmra.mxu1 %vm963_vm2, %v952_v40 }
 0x186   : > { %v886_v45 = vpop.f32.mrf.mxu3 }
 0x187   : > { %v887_v46 = vadd.f32 %v886_v45, %v838_v44 }
 0x189   : > { %v936_v49 = vadd.f32 %v935_v47, %v887_v46 }
 0x18b   : > { %v953_v50 = vmax.f32 %v936_v49, 0.0 }
 0x18d   : > { %1773 = vmatmul.msk.f32.gmra.mxu1 %vm963_vm2, %v953_v50 }
 0x192   : > { %v1029_v1 = vpop.f32.mrf.mxu1 }
 0x193   : > { %v1030_v51 = vadd.f32 %v2388_v2, %v1029_v1 }
 0x195   : > { %v1077_v52 = vmax.f32 %v1030_v51, 0.0 }
 0x197   : > { %1774 = vmatmul.msk.f32.vlgmr.msrb.gmra.mxu2 %vm1098_vm3, %v1077_v52 }
 0x19a   : > { %v1032_v54 = vpop.f32.mrf.mxu1 }
 0x19b   : > { %v1033_v55 = vadd.f32 %v2388_v2, %v1032_v54 }
 0x19d   : > { %v1078_v37 = vmax.f32 %v1033_v55, 0.0 }
 0x19f   : > { %1775 = vmatmul.msk.f32.gmra.mxu2 %vm1098_vm3, %v1078_v37 }
 0x1a2   : > { %v1035_v56 = vpop.f32.mrf.mxu1 }
 0x1a3   : > { %v1036_v21 = vadd.f32 %v2388_v2, %v1035_v56 }
 0x1a5   : > { %v1079_v57 = vmax.f32 %v1036_v21, 0.0 }
 0x1a7   : > { %1776 = vmatmul.msk.f32.gmra.mxu2 %vm1098_vm3, %v1079_v57 }
 0x1aa   : > { %v1038_v43 = vpop.f32.mrf.mxu1 }
 0x1ab   : > { %v1039_v58 = vadd.f32 %v2388_v2, %v1038_v43 }
 0x1ad   : > { %v1080_v9 = vmax.f32 %v1039_v58, 0.0 }
 0x1af   : > { %1777 = vmatmul.msk.f32.gmra.mxu2 %vm1098_vm3, %v1080_v9 }
 0x1b2   : > { %v1041_v60 = vpop.f32.mrf.mxu1 }
 0x1b3   : > { %v1042_v61 = vadd.f32 %v2388_v2, %v1041_v60 }
 0x1b5   : > { %v1081_v42 = vmax.f32 %v1042_v61, 0.0 }
 0x1b7   : > { %1778 = vmatmul.msk.f32.gmra.mxu2 %vm1098_vm3, %v1081_v42 }
 0x1ba   : > { %v1044_v62 = vpop.f32.mrf.mxu1 }
 0x1bb   : > { %v1045_v0 = vadd.f32 %v2388_v2, %v1044_v62 }
 0x1bd   : > { %v1082_v3 = vmax.f32 %v1045_v0, 0.0 }
 0x1bf   : > { %1779 = vmatmul.msk.f32.gmra.mxu2 %vm1098_vm3, %v1082_v3 }
 0x1c2   : > { %v1047_v4 = vpop.f32.mrf.mxu1 }
 0x1c3   : > { %v1048_v5 = vadd.f32 %v2388_v2, %v1047_v4 }
 0x1c5   : > { %v1083_v17 = vmax.f32 %v1048_v5, 0.0 }
 0x1c7   : > { %1780 = vmatmul.msk.f32.gmra.mxu2 %vm1098_vm3, %v1083_v17 }
 0x1ca   : > { %v1050_v8 = vpop.f32.mrf.mxu1 }
 0x1cb   : > { %v1051_v48 = vadd.f32 %v2388_v2, %v1050_v8 }
 0x1cd   : > { %v1084_v7 = vmax.f32 %v1051_v48, 0.0 }
 0x1cf   : > { %1781 = vmatmul.msk.f32.gmra.mxu2 %vm1098_vm3, %v1084_v7 }
 0x1d2   : > { %v1053_v12 = vpop.f32.mrf.mxu1 }
 0x1d3   : > { %v1054_v14 = vadd.f32 %v2388_v2, %v1053_v12 }
 0x1d5   : > { %v1085_v15 = vmax.f32 %v1054_v14, 0.0 }
 0x1d7   : > { %1782 = vmatmul.msk.f32.gmra.mxu2 %vm1098_vm3, %v1085_v15 }
 0x1da   : > { %v1056_v18 = vpop.f32.mrf.mxu1 }
 0x1db   : > { %v1057_v10 = vadd.f32 %v2388_v2, %v1056_v18 }
 0x1dd   : > { %v1086_v13 = vmax.f32 %v1057_v10, 0.0 }
 0x1df   : > { %1783 = vmatmul.msk.f32.gmra.mxu2 %vm1098_vm3, %v1086_v13 }
 0x1e2   : > { %v1059_v22 = vpop.f32.mrf.mxu1 }
 0x1e3   : > { %v1060_v23 = vadd.f32 %v2388_v2, %v1059_v22 }
 0x1e5   : > { %v1087_v24 = vmax.f32 %v1060_v23, 0.0 }
 0x1e7   : > { %1784 = vmatmul.msk.f32.gmra.mxu2 %vm1098_vm3, %v1087_v24 }
 0x1ea   : > { %v1062_v25 = vpop.f32.mrf.mxu1 }
 0x1eb   : > { %v1063_v16 = vadd.f32 %v2388_v2, %v1062_v25 }
 0x1ed   : > { %v1088_v53 = vmax.f32 %v1063_v16, 0.0 }
 0x1ef   : > { %1785 = vmatmul.msk.f32.gmra.mxu2 %vm1098_vm3, %v1088_v53 }
 0x1f2   : > { %v1065_v26 = vpop.f32.mrf.mxu1 }
 0x1f3   : > { %v1066_v6 = vadd.f32 %v2388_v2, %v1065_v26 }
 0x1f5   : > { %v1089_v29 = vmax.f32 %v1066_v6, 0.0 }
 0x1f7   : > { %1786 = vmatmul.msk.f32.gmra.mxu2 %vm1098_vm3, %v1089_v29 }
 0x1fa   : > { %v1068_v30 = vpop.f32.mrf.mxu1 }
 0x1fb   : > { %v1069_v19 = vadd.f32 %v2388_v2, %v1068_v30 }
 0x1fd   : > { %v1090_v32 = vmax.f32 %v1069_v19, 0.0 }
 0x1ff   : > { %1787 = vmatmul.msk.f32.gmra.mxu2 %vm1098_vm3, %v1090_v32 }
 0x202   : > { %v1071_v33 = vpop.f32.mrf.mxu1 }
 0x203   : > { %v1072_v11 = vadd.f32 %v2388_v2, %v1071_v33 }
 0x205   : > { %v1091_v59 = vmax.f32 %v1072_v11, 0.0 }
 0x207   : > { %1788 = vmatmul.msk.f32.gmra.mxu2 %vm1098_vm3, %v1091_v59 }
 0x20a   : > { %v1074_v27 = vpop.f32.mrf.mxu1 }
 0x20b   : > { %v1075_v28 = vadd.f32 %v2388_v2, %v1074_v27 }
 0x20d   : > { %v1092_v34 = vmax.f32 %v1075_v28, 0.0 }
 0x20f   : > { %1789 = vmatmul.msk.f32.gmra.mxu2 %vm1098_vm3, %v1092_v34 }
 0x21a   : > { %v1164_v36 = vpop.f32.mrf.mxu2 }
 0x21b   : > { %v1165_v38 = vadd.f32 %v2425_v35, %v1164_v36 }
 0x21d   : > { %v1790_v39 = vmul.f32 -1.442695, %v1165_v38 }
 0x21f   : > { %1882 = vpow2.f32 %v1790_v39 }
 0x222   : > { %v1167_v20 = vpop.f32.mrf.mxu2 }
 0x223   : > { %v1168_v31 = vadd.f32 %v2425_v35, %v1167_v20 }
 0x225   : > { %v1883_v63 = vpop.eup %1882  ;;  %v1791_v41 = vmul.f32 -1.442695, %v1168_v31 }
 0x226   : > { %v1260_v40 = vadd.f32 1.0, %v1883_v63 }
 0x227   : > { %1884 = vpow2.f32 %v1791_v41 }
 0x228   : > { %1886 = vrcp.f32 %v1260_v40  ;;  %v1287_v51 = vand.u32 2147483648, %v1260_v40  ;;  %v1285_v55 = vand.u32 2147483647, %v1260_v40  ;;  %vm1281_vm5 = vweird.f32 %v1260_v40 }
 0x22a   : > { %v1170_v44 = vpop.f32.mrf.mxu2  ;;  %v1288_v58 = vor.u32 1.1754944e-38, %v1287_v51  ;;  %vm1286_vm8 = vcmp.eq.f32.partialorder %v1285_v55, 8.507059e+37 }
 0x22b   : > { %v1171_v45 = vadd.f32 %v2425_v35, %v1170_v44 }
 0x22d   : > { %v1885_v46 = vpop.eup %1884  ;;  %v1792_v47 = vmul.f32 -1.442695, %v1171_v45 }
 0x22e   : > { %v1887_v49 = vpop.eup %1886  ;;  %v1261_v50 = vadd.f32 1.0, %v1885_v46 }
 0x22f   : > { %v1277_v2 = vmul.f32 %v1887_v49, %v1260_v40  ;;  %1888 = vpow2.f32 %v1792_v47  ;;  %vm1282_vm4 = vweird.f32 %v1887_v49 }
 0x230   : > { %1890 = vrcp.f32 %v1261_v50  ;;  %vm1283_vm6 = vmor %vm1281_vm5, %vm1282_vm4  ;;  %v1302_v0 = vand.u32 2147483648, %v1261_v50  ;;  %v1300_v5 = vand.u32 2147483647, %v1261_v50  ;;  %vm1296_vm10 = vweird.f32 %v1261_v50 }
 0x231   : > { %v1278_v1 = vsub.f32 1.0, %v1277_v2 }
 0x232   : > { %v1173_v52 = vpop.f32.mrf.mxu2  ;;  %v1303_v14 = vor.u32 1.1754944e-38, %v1302_v0  ;;  %vm1301_vm12 = vcmp.eq.f32.partialorder %v1300_v5, 8.507059e+37 }
 0x233   : > { %v1279_v54 = vmul.f32 %v1887_v49, %v1278_v1  ;;  %v1174_v37 = vadd.f32 %v2425_v35, %v1173_v52 }
 0x235   : > { %v1889_v56 = vpop.eup %1888  ;;  %v1280_v21 = vadd.f32 %v1887_v49, %v1279_v54  ;;  %v1793_v57 = vmul.f32 -1.442695, %v1174_v37 }
 0x236   : > { %v1891_v43 = vpop.eup %1890  ;;  %v1262_v9 = vadd.f32 1.0, %v1889_v56 }
 0x237   : > { %v1284_v60 = vsel %vm1283_vm6, %v1887_v49, %v1280_v21  ;;  %v1292_v61 = vmul.f32 %v1891_v43, %v1261_v50  ;;  %1892 = vpow2.f32 %v1793_v57  ;;  %vm1297_vm9 = vweird.f32 %v1891_v43 }
 0x238   : > { %v1289_v42 = vsel %vm1286_vm8, %v1288_v58, %v1284_v60  ;;  %1894 = vrcp.f32 %v1262_v9  ;;  %vm1298_vm11 = vmor %vm1296_vm10, %vm1297_vm9  ;;  %v1317_v23 = vand.u32 2147483648, %v1262_v9  ;;  %v1315_v16 = vand.u32 2147483647, %v1262_v9 }
 0x239   : > { %1517 = vst.msk [vmem:[%s2435_s22] sm:$0xff] %vm1516_vm7, %v1289_v42  ;;  %v1293_v62 = vsub.f32 1.0, %v1292_v61  ;;  %vm1311_vm14 = vweird.f32 %v1262_v9 }
 0x23a   : > { %v1176_v3 = vpop.f32.mrf.mxu2  ;;  %v1318_v19 = vor.u32 1.1754944e-38, %v1317_v23  ;;  %vm1316_vm0 = vcmp.eq.f32.partialorder %v1315_v16, 8.507059e+37 }
 0x23b   : > { %v1294_v4 = vmul.f32 %v1891_v43, %v1293_v62  ;;  %v1177_v17 = vadd.f32 %v2425_v35, %v1176_v3 }
 0x23d   : > { %v1893_v8 = vpop.eup %1892  ;;  %v1295_v48 = vadd.f32 %v1891_v43, %v1294_v4  ;;  %v1794_v7 = vmul.f32 -1.442695, %v1177_v17 }
 0x23e   : > { %v1895_v12 = vpop.eup %1894  ;;  %v1263_v15 = vadd.f32 1.0, %v1893_v8 }
 0x23f   : > { %v1299_v18 = vsel %vm1298_vm11, %v1891_v43, %v1295_v48  ;;  %v1307_v10 = vmul.f32 %v1895_v12, %v1262_v9  ;;  %1896 = vpow2.f32 %v1794_v7  ;;  %vm1312_vm13 = vweird.f32 %v1895_v12 }
 0x240   : > { %v1304_v13 = vsel %vm1301_vm12, %v1303_v14, %v1299_v18  ;;  %1898 = vrcp.f32 %v1263_v15  ;;  %vm1313_vm15 = vmor %vm1311_vm14, %vm1312_vm13  ;;  %v1332_v28 = vand.u32 2147483648, %v1263_v15  ;;  %v1330_v38 = vand.u32 2147483647, %v1263_v15 }
 0x241   : > { %1518 = vst.msk [vmem:[%s2435_s22 + $0x8] sm:$0xff] %vm1516_vm7, %v1304_v13  ;;  %v1308_v22 = vsub.f32 1.0, %v1307_v10  ;;  %vm1326_vm2 = vweird.f32 %v1263_v15 }
 0x242   : > { %v1179_v24 = vpop.f32.mrf.mxu2  ;;  %v1333_v40 = vor.u32 1.1754944e-38, %v1332_v28  ;;  %vm1331_vm4 = vcmp.eq.f32.partialorder %v1330_v38, 8.507059e+37 }
 0x243   : > { %v1309_v25 = vmul.f32 %v1895_v12, %v1308_v22  ;;  %v1180_v53 = vadd.f32 %v2425_v35, %v1179_v24 }
 0x245   : > { %v1897_v26 = vpop.eup %1896  ;;  %v1310_v6 = vadd.f32 %v1895_v12, %v1309_v25  ;;  %v1795_v29 = vmul.f32 -1.442695, %v1180_v53 }
 0x246   : > { %v1899_v30 = vpop.eup %1898  ;;  %v1264_v32 = vadd.f32 1.0, %v1897_v26 }
 0x247   : > { %v1314_v33 = vsel %vm1313_vm15, %v1895_v12, %v1310_v6  ;;  %v1322_v11 = vmul.f32 %v1899_v30, %v1263_v15  ;;  %1900 = vpow2.f32 %v1795_v29  ;;  %vm1327_vm1 = vweird.f32 %v1899_v30 }
 0x248   : > { %v1319_v59 = vsel %vm1316_vm0, %v1318_v19, %v1314_v33  ;;  %1902 = vrcp.f32 %v1264_v32  ;;  %vm1328_vm3 = vmor %vm1326_vm2, %vm1327_vm1  ;;  %v1347_v50 = vand.u32 2147483648, %v1264_v32  ;;  %v1345_v51 = vand.u32 2147483647, %v1264_v32 }
 0x249   : > { %1519 = vst.msk [vmem:[%s2435_s22 + $0x10] sm:$0xff] %vm1516_vm7, %v1319_v59  ;;  %v1323_v27 = vsub.f32 1.0, %v1322_v11  ;;  %vm1341_vm6 = vweird.f32 %v1264_v32 }
 0x24a   : > { %v1182_v34 = vpop.f32.mrf.mxu2  ;;  %v1348_v21 = vor.u32 1.1754944e-38, %v1347_v50  ;;  %vm1346_vm9 = vcmp.eq.f32.partialorder %v1345_v51, 8.507059e+37 }
 0x24b   : > { %v1324_v36 = vmul.f32 %v1899_v30, %v1323_v27  ;;  %v1183_v39 = vadd.f32 %v2425_v35, %v1182_v34 }
 0x24d   : > { %v1901_v20 = vpop.eup %1900  ;;  %v1325_v31 = vadd.f32 %v1899_v30, %v1324_v36  ;;  %v1796_v63 = vmul.f32 -1.442695, %v1183_v39 }
 0x24e   : > { %v1903_v41 = vpop.eup %1902  ;;  %v1265_v44 = vadd.f32 1.0, %v1901_v20 }
 0x24f   : > { %v1329_v45 = vsel %vm1328_vm3, %v1899_v30, %v1325_v31  ;;  %v1337_v46 = vmul.f32 %v1903_v41, %v1264_v32  ;;  %1904 = vpow2.f32 %v1796_v63  ;;  %vm1342_vm5 = vweird.f32 %v1903_v41 }
 0x250   : > { %v1334_v47 = vsel %vm1331_vm4, %v1333_v40, %v1329_v45  ;;  %1906 = vrcp.f32 %v1265_v44  ;;  %vm1343_vm8 = vmor %vm1341_vm6, %vm1342_vm5  ;;  %v1362_v61 = vand.u32 2147483648, %v1265_v44  ;;  %v1360_v0 = vand.u32 2147483647, %v1265_v44 }
 0x251   : > { %1520 = vst.msk [vmem:[%s2435_s22 + $0x18] sm:$0xff] %vm1516_vm7, %v1334_v47  ;;  %v1338_v49 = vsub.f32 1.0, %v1337_v46  ;;  %vm1356_vm11 = vweird.f32 %v1265_v44 }
 0x252   : > { %v1185_v2 = vpop.f32.mrf.mxu2  ;;  %v1363_v48 = vor.u32 1.1754944e-38, %v1362_v61  ;;  %vm1361_vm13 = vcmp.eq.f32.partialorder %v1360_v0, 8.507059e+37 }
 0x253   : > { %v1339_v1 = vmul.f32 %v1903_v41, %v1338_v49  ;;  %v1186_v52 = vadd.f32 %v2425_v35, %v1185_v2 }
 0x255   : > { %v1905_v54 = vpop.eup %1904  ;;  %v1340_v55 = vadd.f32 %v1903_v41, %v1339_v1  ;;  %v1797_v37 = vmul.f32 -1.442695, %v1186_v52 }
 0x256   : > { %v1907_v56 = vpop.eup %1906  ;;  %v1266_v57 = vadd.f32 1.0, %v1905_v54 }
 0x257   : > { %v1344_v43 = vsel %vm1343_vm8, %v1903_v41, %v1340_v55  ;;  %v1352_v58 = vmul.f32 %v1907_v56, %v1265_v44  ;;  %1908 = vpow2.f32 %v1797_v37  ;;  %vm1357_vm10 = vweird.f32 %v1907_v56 }
 0x258   : > { %v1349_v9 = vsel %vm1346_vm9, %v1348_v21, %v1344_v43  ;;  %1910 = vrcp.f32 %v1266_v57  ;;  %vm1358_vm12 = vmor %vm1356_vm11, %vm1357_vm10  ;;  %v1377_v10 = vand.u32 2147483648, %v1266_v57  ;;  %v1375_v23 = vand.u32 2147483647, %v1266_v57 }
 0x259   : > { %1521 = vst.msk [vmem:[%s2435_s22 + $0x20] sm:$0xff] %vm1516_vm7, %v1349_v9  ;;  %v1353_v60 = vsub.f32 1.0, %v1352_v58  ;;  %vm1371_vm15 = vweird.f32 %v1266_v57 }
 0x25a   : > { %v1188_v42 = vpop.f32.mrf.mxu2  ;;  %v1378_v6 = vor.u32 1.1754944e-38, %v1377_v10  ;;  %vm1376_vm1 = vcmp.eq.f32.partialorder %v1375_v23, 8.507059e+37 }
 0x25b   : > { %v1354_v62 = vmul.f32 %v1907_v56, %v1353_v60  ;;  %v1189_v3 = vadd.f32 %v2425_v35, %v1188_v42 }
 0x25d   : > { %v1909_v4 = vpop.eup %1908  ;;  %v1355_v5 = vadd.f32 %v1907_v56, %v1354_v62  ;;  %v1798_v17 = vmul.f32 -1.442695, %v1189_v3 }
 0x25e   : > { %v1911_v8 = vpop.eup %1910  ;;  %v1267_v7 = vadd.f32 1.0, %v1909_v4 }
 0x25f   : > { %v1359_v12 = vsel %vm1358_vm12, %v1907_v56, %v1355_v5  ;;  %v1367_v14 = vmul.f32 %v1911_v8, %v1266_v57  ;;  %1912 = vpow2.f32 %v1798_v17  ;;  %vm1372_vm14 = vweird.f32 %v1911_v8 }
 0x260   : > { %v1364_v15 = vsel %vm1361_vm13, %v1363_v48, %v1359_v12  ;;  %1914 = vrcp.f32 %v1267_v7  ;;  %vm1373_vm0 = vmor %vm1371_vm15, %vm1372_vm14  ;;  %v1392_v11 = vand.u32 2147483648, %v1267_v7  ;;  %v1390_v28 = vand.u32 2147483647, %v1267_v7 }
 0x261   : > { %1522 = vst.msk [vmem:[%s2435_s22 + $0x28] sm:$0xff] %vm1516_vm7, %v1364_v15  ;;  %v1368_v18 = vsub.f32 1.0, %v1367_v14  ;;  %vm1386_vm3 = vweird.f32 %v1267_v7 }
 0x262   : > { %v1191_v13 = vpop.f32.mrf.mxu2  ;;  %v1393_v31 = vor.u32 1.1754944e-38, %v1392_v11  ;;  %vm1391_vm5 = vcmp.eq.f32.partialorder %v1390_v28, 8.507059e+37 }
 0x263   : > { %v1369_v22 = vmul.f32 %v1911_v8, %v1368_v18  ;;  %v1192_v24 = vadd.f32 %v2425_v35, %v1191_v13 }
 0x265   : > { %v1913_v25 = vpop.eup %1912  ;;  %v1370_v16 = vadd.f32 %v1911_v8, %v1369_v22  ;;  %v1799_v53 = vmul.f32 -1.442695, %v1192_v24 }
 0x266   : > { %v1915_v26 = vpop.eup %1914  ;;  %v1268_v29 = vadd.f32 1.0, %v1913_v25 }
 0x267   : > { %v1374_v30 = vsel %vm1373_vm0, %v1911_v8, %v1370_v16  ;;  %v1382_v19 = vmul.f32 %v1915_v26, %v1267_v7  ;;  %1916 = vpow2.f32 %v1799_v53  ;;  %vm1387_vm2 = vweird.f32 %v1915_v26 }
 0x268   : > { %v1379_v32 = vsel %vm1376_vm1, %v1378_v6, %v1374_v30  ;;  %1918 = vrcp.f32 %v1268_v29  ;;  %vm1388_vm4 = vmor %vm1386_vm3, %vm1387_vm2  ;;  %v1407_v46 = vand.u32 2147483648, %v1268_v29  ;;  %v1405_v50 = vand.u32 2147483647, %v1268_v29 }
 0x269   : > { %1523 = vst.msk [vmem:[%s2435_s22 + $0x30] sm:$0xff] %vm1516_vm7, %v1379_v32  ;;  %v1383_v33 = vsub.f32 1.0, %v1382_v19  ;;  %vm1401_vm8 = vweird.f32 %v1268_v29 }
 0x26a   : > { %v1194_v59 = vpop.f32.mrf.mxu2  ;;  %v1408_v55 = vor.u32 1.1754944e-38, %v1407_v46  ;;  %vm1406_vm10 = vcmp.eq.f32.partialorder %v1405_v50, 8.507059e+37 }
 0x26b   : > { %v1384_v27 = vmul.f32 %v1915_v26, %v1383_v33  ;;  %v1195_v34 = vadd.f32 %v2425_v35, %v1194_v59 }
 0x26d   : > { %v1917_v36 = vpop.eup %1916  ;;  %v1385_v38 = vadd.f32 %v1915_v26, %v1384_v27  ;;  %v1800_v39 = vmul.f32 -1.442695, %v1195_v34 }
 0x26e   : > { %v1919_v20 = vpop.eup %1918  ;;  %v1269_v63 = vadd.f32 1.0, %v1917_v36 }
 0x26f   : > { %v1389_v41 = vsel %vm1388_vm4, %v1915_v26, %v1385_v38  ;;  %v1397_v40 = vmul.f32 %v1919_v20, %v1268_v29  ;;  %1920 = vpow2.f32 %v1800_v39  ;;  %vm1402_vm6 = vweird.f32 %v1919_v20 }
 0x270   : > { %v1394_v44 = vsel %vm1391_vm5, %v1393_v31, %v1389_v41  ;;  %1922 = vrcp.f32 %v1269_v63  ;;  %vm1403_vm9 = vmor %vm1401_vm8, %vm1402_vm6  ;;  %v1422_v58 = vand.u32 2147483648, %v1269_v63  ;;  %v1420_v61 = vand.u32 2147483647, %v1269_v63 }
 0x271   : > { %1524 = vst.msk [vmem:[%s2435_s22 + $0x38] sm:$0xff] %vm1516_vm7, %v1394_v44  ;;  %v1398_v45 = vsub.f32 1.0, %v1397_v40  ;;  %vm1416_vm12 = vweird.f32 %v1269_v63 }
 0x272   : > { %v1197_v47 = vpop.f32.mrf.mxu2  ;;  %v1423_v5 = vor.u32 1.1754944e-38, %v1422_v58  ;;  %vm1421_vm14 = vcmp.eq.f32.partialorder %v1420_v61, 8.507059e+37 }
 0x273   : > { %v1399_v49 = vmul.f32 %v1919_v20, %v1398_v45  ;;  %v1198_v2 = vadd.f32 %v2425_v35, %v1197_v47 }
 0x275   : > { %v1921_v1 = vpop.eup %1920  ;;  %v1400_v51 = vadd.f32 %v1919_v20, %v1399_v49  ;;  %v1801_v52 = vmul.f32 -1.442695, %v1198_v2 }
 0x276   : > { %v1923_v54 = vpop.eup %1922  ;;  %v1270_v37 = vadd.f32 1.0, %v1921_v1 }
 0x277   : > { %v1404_v56 = vsel %vm1403_vm9, %v1919_v20, %v1400_v51  ;;  %v1412_v21 = vmul.f32 %v1923_v54, %v1269_v63  ;;  %1924 = vpow2.f32 %v1801_v52  ;;  %vm1417_vm11 = vweird.f32 %v1923_v54 }
 0x278   : > { %v1409_v57 = vsel %vm1406_vm10, %v1408_v55, %v1404_v56  ;;  %1926 = vrcp.f32 %v1270_v37  ;;  %vm1418_vm13 = vmor %vm1416_vm12, %vm1417_vm11  ;;  %v1437_v14 = vand.u32 2147483648, %v1270_v37  ;;  %v1435_v10 = vand.u32 2147483647, %v1270_v37 }
 0x279   : > { %1525 = vst.msk [vmem:[%s2435_s22 + $0x40] sm:$0xff] %vm1516_vm7, %v1409_v57  ;;  %v1413_v43 = vsub.f32 1.0, %v1412_v21  ;;  %vm1431_vm0 = vweird.f32 %v1270_v37 }
 0x27a   : > { %v1200_v9 = vpop.f32.mrf.mxu2  ;;  %v1438_v16 = vor.u32 1.1754944e-38, %v1437_v14  ;;  %vm1436_vm2 = vcmp.eq.f32.partialorder %v1435_v10, 8.507059e+37 }
 0x27b   : > { %v1414_v60 = vmul.f32 %v1923_v54, %v1413_v43  ;;  %v1201_v42 = vadd.f32 %v2425_v35, %v1200_v9 }
 0x27d   : > { %v1925_v62 = vpop.eup %1924  ;;  %v1415_v0 = vadd.f32 %v1923_v54, %v1414_v60  ;;  %v1802_v3 = vmul.f32 -1.442695, %v1201_v42 }
 0x27e   : > { %v1927_v4 = vpop.eup %1926  ;;  %v1271_v17 = vadd.f32 1.0, %v1925_v62 }
 0x27f   : > { %v1419_v8 = vsel %vm1418_vm13, %v1923_v54, %v1415_v0  ;;  %v1427_v48 = vmul.f32 %v1927_v4, %v1270_v37  ;;  %1928 = vpow2.f32 %v1802_v3  ;;  %vm1432_vm15 = vweird.f32 %v1927_v4 }
 0x280   : > { %v1424_v7 = vsel %vm1421_vm14, %v1423_v5, %v1419_v8  ;;  %1930 = vrcp.f32 %v1271_v17  ;;  %vm1433_vm1 = vmor %vm1431_vm0, %vm1432_vm15  ;;  %v1452_v19 = vand.u32 2147483648, %v1271_v17  ;;  %v1450_v11 = vand.u32 2147483647, %v1271_v17 }
 0x281   : > { %1526 = vst.msk [vmem:[%s2435_s22 + $0x48] sm:$0xff] %vm1516_vm7, %v1424_v7  ;;  %v1428_v12 = vsub.f32 1.0, %v1427_v48  ;;  %vm1446_vm4 = vweird.f32 %v1271_v17 }
 0x282   : > { %v1203_v15 = vpop.f32.mrf.mxu2  ;;  %v1453_v38 = vor.u32 1.1754944e-38, %v1452_v19  ;;  %vm1451_vm6 = vcmp.eq.f32.partialorder %v1450_v11, 8.507059e+37 }
 0x283   : > { %v1429_v18 = vmul.f32 %v1927_v4, %v1428_v12  ;;  %v1204_v13 = vadd.f32 %v2425_v35, %v1203_v15 }
 0x285   : > { %v1929_v22 = vpop.eup %1928  ;;  %v1430_v23 = vadd.f32 %v1927_v4, %v1429_v18  ;;  %v1803_v24 = vmul.f32 -1.442695, %v1204_v13 }
 0x286   : > { %v1931_v25 = vpop.eup %1930  ;;  %v1272_v53 = vadd.f32 1.0, %v1929_v22 }
 0x287   : > { %v1434_v26 = vsel %vm1433_vm1, %v1927_v4, %v1430_v23  ;;  %v1442_v6 = vmul.f32 %v1931_v25, %v1271_v17  ;;  %1932 = vpow2.f32 %v1803_v24  ;;  %vm1447_vm3 = vweird.f32 %v1931_v25 }
 0x288   : > { %v1439_v29 = vsel %vm1436_vm2, %v1438_v16, %v1434_v26  ;;  %1934 = vrcp.f32 %v1272_v53  ;;  %vm1448_vm5 = vmor %vm1446_vm4, %vm1447_vm3  ;;  %v1467_v40 = vand.u32 2147483648, %v1272_v53  ;;  %v1465_v46 = vand.u32 2147483647, %v1272_v53 }
 0x289   : > { %1527 = vst.msk [vmem:[%s2435_s22 + $0x50] sm:$0xff] %vm1516_vm7, %v1439_v29  ;;  %v1443_v30 = vsub.f32 1.0, %v1442_v6  ;;  %vm1461_vm9 = vweird.f32 %v1272_v53 }
 0x28a   : > { %v1206_v32 = vpop.f32.mrf.mxu2  ;;  %v1468_v51 = vor.u32 1.1754944e-38, %v1467_v40  ;;  %vm1466_vm11 = vcmp.eq.f32.partialorder %v1465_v46, 8.507059e+37 }
 0x28b   : > { %v1444_v33 = vmul.f32 %v1931_v25, %v1443_v30  ;;  %v1207_v59 = vadd.f32 %v2425_v35, %v1206_v32 }
 0x28d   : > { %v1933_v27 = vpop.eup %1932  ;;  %v1445_v28 = vadd.f32 %v1931_v25, %v1444_v33  ;;  %v1804_v34 = vmul.f32 -1.442695, %v1207_v59 }
 0x28e   : > { %v1935_v36 = vpop.eup %1934  ;;  %v1273_v39 = vadd.f32 1.0, %v1933_v27 }
 0x28f   : > { %v1449_v20 = vsel %vm1448_vm5, %v1931_v25, %v1445_v28  ;;  %v1457_v31 = vmul.f32 %v1935_v36, %v1272_v53  ;;  %1936 = vpow2.f32 %v1804_v34  ;;  %vm1462_vm8 = vweird.f32 %v1935_v36 }
 0x290   : > { %v1454_v63 = vsel %vm1451_vm6, %v1453_v38, %v1449_v20  ;;  %1938 = vrcp.f32 %v1273_v39  ;;  %vm1463_vm10 = vmor %vm1461_vm9, %vm1462_vm8  ;;  %v1482_v21 = vand.u32 2147483648, %v1273_v39  ;;  %v1480_v57 = vand.u32 2147483647, %v1273_v39 }
 0x291   : > { %1528 = vst.msk [vmem:[%s2435_s22 + $0x58] sm:$0xff] %vm1516_vm7, %v1454_v63  ;;  %v1458_v41 = vsub.f32 1.0, %v1457_v31  ;;  %vm1476_vm13 = vweird.f32 %v1273_v39 }
 0x292   : > { %v1209_v44 = vpop.f32.mrf.mxu2  ;;  %v1483_v60 = vor.u32 1.1754944e-38, %v1482_v21  ;;  %vm1481_vm15 = vcmp.eq.f32.partialorder %v1480_v57, 8.507059e+37 }
 0x293   : > { %v1459_v45 = vmul.f32 %v1935_v36, %v1458_v41  ;;  %v1210_v47 = vadd.f32 %v2425_v35, %v1209_v44 }
 0x295   : > { %v1937_v49 = vpop.eup %1936  ;;  %v1460_v50 = vadd.f32 %v1935_v36, %v1459_v45  ;;  %v1805_v2 = vmul.f32 -1.442695, %v1210_v47 }
 0x296   : > { %v1939_v1 = vpop.eup %1938  ;;  %v1274_v52 = vadd.f32 1.0, %v1937_v49 }
 0x297   : > { %v1464_v54 = vsel %vm1463_vm10, %v1935_v36, %v1460_v50  ;;  %v1472_v55 = vmul.f32 %v1939_v1, %v1273_v39  ;;  %1940 = vpow2.f32 %v1805_v2  ;;  %vm1477_vm12 = vweird.f32 %v1939_v1 }
 0x298   : > { %v1469_v37 = vsel %vm1466_vm11, %v1468_v51, %v1464_v54  ;;  %1942 = vrcp.f32 %v1274_v52  ;;  %vm1478_vm14 = vmor %vm1476_vm13, %vm1477_vm12  ;;  %v1497_v4 = vand.u32 2147483648, %v1274_v52  ;;  %v1495_v17 = vand.u32 2147483647, %v1274_v52 }
 0x299   : > { %1529 = vst.msk [vmem:[%s2435_s22 + $0x60] sm:$0xff] %vm1516_vm7, %v1469_v37  ;;  %v1473_v56 = vsub.f32 1.0, %v1472_v55  ;;  %vm1491_vm1 = vweird.f32 %v1274_v52 }
 0x29a   : > { %v1498_v7 = vor.u32 1.1754944e-38, %v1497_v4  ;;  %vm1496_vm3 = vcmp.eq.f32.partialorder %v1495_v17, 8.507059e+37 }
 0x29b   : > { %v1474_v35 = vmul.f32 %v1939_v1, %v1473_v56 }
 0x29d   : > { %v1941_v43 = vpop.eup %1940  ;;  %v1475_v58 = vadd.f32 %v1939_v1, %v1474_v35 }
 0x29e   : > { %v1943_v9 = vpop.eup %1942  ;;  %v1275_v61 = vadd.f32 1.0, %v1941_v43 }
 0x29f   : > { %v1479_v42 = vsel %vm1478_vm14, %v1939_v1, %v1475_v58  ;;  %v1487_v62 = vmul.f32 %v1943_v9, %v1274_v52  ;;  %vm1492_vm0 = vweird.f32 %v1943_v9 }
 0x2a0   : > { %v1484_v0 = vsel %vm1481_vm15, %v1483_v60, %v1479_v42  ;;  %1944 = vrcp.f32 %v1275_v61  ;;  %vm1493_vm2 = vmor %vm1491_vm1, %vm1492_vm0  ;;  %v1512_v10 = vand.u32 2147483648, %v1275_v61  ;;  %v1510_v22 = vand.u32 2147483647, %v1275_v61 }
 0x2a1   : > { %1530 = vst.msk [vmem:[%s2435_s22 + $0x68] sm:$0xff] %vm1516_vm7, %v1484_v0  ;;  %v1488_v3 = vsub.f32 1.0, %v1487_v62  ;;  %vm1506_vm5 = vweird.f32 %v1275_v61 }
 0x2a2   : > { %v1513_v24 = vor.u32 1.1754944e-38, %v1512_v10  ;;  %vm1511_vm8 = vcmp.eq.f32.partialorder %v1510_v22, 8.507059e+37 }
 0x2a3   : > { %v1489_v5 = vmul.f32 %v1943_v9, %v1488_v3 }
 0x2a5   : > { %v1490_v8 = vadd.f32 %v1943_v9, %v1489_v5 }
 0x2a6   : > { %v1945_v48 = vpop.eup %1944 }
 0x2a7   : > { %v1494_v12 = vsel %vm1493_vm2, %v1943_v9, %v1490_v8  ;;  %v1502_v14 = vmul.f32 %v1945_v48, %v1275_v61  ;;  %vm1507_vm4 = vweird.f32 %v1945_v48 }
 0x2a8   : > { %v1499_v15 = vsel %vm1496_vm3, %v1498_v7, %v1494_v12  ;;  %vm1508_vm6 = vmor %vm1506_vm5, %vm1507_vm4 }
 0x2a9   : > { %1531 = vst.msk [vmem:[%s2435_s22 + $0x70] sm:$0xff] %vm1516_vm7, %v1499_v15  ;;  %v1503_v18 = vsub.f32 1.0, %v1502_v14 }
 0x2ab   : > { %v1504_v13 = vmul.f32 %v1945_v48, %v1503_v18 }
 0x2ad   : > { %v1505_v23 = vadd.f32 %v1945_v48, %v1504_v13 }
 0x2af   : > { %v1509_v25 = vsel %vm1508_vm6, %v1945_v48, %v1505_v23 }
 0x2b0   : > { %v1514_v16 = vsel %vm1511_vm8, %v1513_v24, %v1509_v25 }
 0x2b1   : > { %1532 = vst.msk [vmem:[%s2435_s22 + $0x78] sm:$0xff] %vm1516_vm7, %v1514_v16 }
 0x2b2 PF: > { %s15_s18 = sadd.s32 1, %s1952_s18  }
 0x2b3   : > { %p12_p4 = scmp.ge.s32.totalorder %s15_s18, 4  }
 0x2b5   :  { %14 = sbr.rel (!%p12_p4) target bundleno = 1 (0x1), region = 70 }

</bundles_post_ra>
